<compile_context>
chip_gen: v5e
topology: v5e:2x2
jax: 0.10.0
libtpu: 0.0.40
codegen_flags: <defaults>
</compile_context>

<pallas_src>
import functools
import math

import jax
import jax.numpy as jnp
from jax.experimental import pallas as pl
from jax.experimental.pallas import tpu as pltpu


def _layer_norm(x, gamma, beta, eps=1e-5):
    # Two-pass LayerNorm (mean, then centered variance) — matches PyTorch form.
    mean = jnp.mean(x, axis=-1, keepdims=True)
    xc = x - mean
    var = jnp.mean(xc * xc, axis=-1, keepdims=True)
    return xc * jax.lax.rsqrt(var + eps) * gamma + beta


def transformer_block_kernel(
    # inputs
    emb_ref,
    wqkv_ref, bqkv_ref, wo_ref, bo_ref, ln1w_ref, ln1b_ref,
    w1_ref, b1_ref, w2_ref, b2_ref, ln2w_ref, ln2b_ref,
    # outputs
    out_ref, attn_w_ref, attn_s_ref,
    *, n_heads, d_head, seq_len, compute_dtype,
):
    H, dh, S = n_heads, d_head, seq_len
    d_inner = H * dh

    x = emb_ref[0]                                   # (S, D) f32
    x_c = x.astype(compute_dtype)

    # ---- fused QKV projection (one wide MXU pass; f32 accumulation) ----
    # 1/sqrt(d_head) is already folded into the Q third of wqkv/bqkv.
    qkv = (jnp.dot(x_c, wqkv_ref[...], preferred_element_type=jnp.float32)
           + bqkv_ref[...]).astype(compute_dtype)    # (S, 3*d_inner), cast once
    q = qkv[:, 0 * d_inner:1 * d_inner]
    k = qkv[:, 1 * d_inner:2 * d_inner]
    v = qkv[:, 2 * d_inner:3 * d_inner]

    # (S, H, dh) -> (H, S, dh): lane-layout-aware shuffle, once per operand.
    qh = pltpu.einshape("shd->hsd", q.reshape(S, H, dh))
    kh = pltpu.einshape("shd->hsd", k.reshape(S, H, dh))
    vh = pltpu.einshape("shd->hsd", v.reshape(S, H, dh))

    # ---- attention: all heads in one batched contraction ----
    scores = jnp.einsum("hqd,hkd->hqk", qh, kh,
                        preferred_element_type=jnp.float32)      # (H, S, S) f32
    attn_s_ref[0] = scores                                       # slab store

    m = jnp.max(scores, axis=-1, keepdims=True)
    p = jnp.exp(scores - m)
    denom = jnp.sum(p, axis=-1, keepdims=True)
    w = p / denom                                    # exact divide: rows sum to 1
    attn_w_ref[0] = w                                            # slab store

    ctx = jnp.einsum("hqk,hkd->hqd", w.astype(compute_dtype), vh,
                     preferred_element_type=jnp.float32)         # (H, S, dh)
    ctx_flat = pltpu.einshape(
        "hsd->shd", ctx.astype(compute_dtype)).reshape(S, d_inner)

    # ---- output projection + residual + post-LayerNorm ----
    attn_out = jnp.dot(ctx_flat, wo_ref[...],
                       preferred_element_type=jnp.float32) + bo_ref[...]
    x1 = _layer_norm(attn_out + x, ln1w_ref[...], ln1b_ref[...])

    # ---- FFN + residual + post-LayerNorm ----
    h = jnp.dot(x1.astype(compute_dtype), w1_ref[...],
                preferred_element_type=jnp.float32) + b1_ref[...]
    h = jax.nn.gelu(h, approximate=True)   # TODO(synk): exact-erf GELU parity.
    ff = jnp.dot(h.astype(compute_dtype), w2_ref[...],
                 preferred_element_type=jnp.float32) + b2_ref[...]
    x2 = _layer_norm(ff + x1, ln2w_ref[...], ln2b_ref[...])

    out_ref[0] = x2.astype(out_ref.dtype)


def _vmem_limit_bytes(S, D, H, d_head, d_ff, compute_dtype):
    """Budget: resident weights + double-buffered per-step blocks + live temps."""
    d_inner = H * d_head
    cb = jnp.dtype(compute_dtype).itemsize
    f32 = 4
    weights = (D * 3 * d_inner + d_inner * D + D * d_ff + d_ff * D) * cb
    weights += (3 * d_inner + 5 * D + d_ff) * f32                 # biases + LN params
    io = 2 * (2 * S * D * f32) + 2 * (2 * H * S * S * f32)        # emb/out + attn outs
    temps = (S * 3 * d_inner * (f32 + cb)
             + 3 * H * S * d_head * (f32 + cb)
             + 4 * H * S * S * f32
             + S * d_ff * (f32 + cb)
             + 6 * S * D * f32)
    est = weights + io + temps
    # Headroom, clamped to a value that is legal on every generation (v7x: 64 MiB).
    return int(min(64 * 1024 * 1024, max(32 * 1024 * 1024, 2 * est)))


def transformer_block(emb, params, *, n_heads, d_head, compute_dtype=jnp.bfloat16):
    B, S, D = emb.shape
    d_inner = n_heads * d_head
    d_ff = params["w1"].shape[1]
    scale = 1.0 / math.sqrt(d_head)

    # Fused QKV weight/bias; softmax scale folded into the Q third (identical math).
    wqkv = jnp.concatenate(
        [params["wq"] * scale, params["wk"], params["wv"]], axis=1
    ).astype(compute_dtype)                                       # (D, 3*d_inner) bf16
    bqkv = jnp.concatenate(
        [params["bq"] * scale, params["bk"], params["bv"]], axis=1)  # (1, 3*d_inner) f32

    weights = [
        wqkv, bqkv,
        params["wo"].astype(compute_dtype), params["bo"],
        params["ln1_w"], params["ln1_b"],
        params["w1"].astype(compute_dtype), params["b1"],
        params["w2"].astype(compute_dtype), params["b2"],
        params["ln2_w"], params["ln2_b"],
    ]

    # Weights live whole-array in VMEM (single buffer; never change across grid).
    weight_spec = pl.BlockSpec(memory_space=pltpu.MemorySpace.VMEM)
    in_specs = [pl.BlockSpec((1, S, D), lambda b: (b, 0, 0))]
    in_specs += [weight_spec] * len(weights)

    out_shape = (
        jax.ShapeDtypeStruct((B, S, D), jnp.float32),              # emb out
        jax.ShapeDtypeStruct((B, n_heads, S, S), jnp.float32),     # attn_weight
        jax.ShapeDtypeStruct((B, n_heads, S, S), jnp.float32),     # attn_score
    )
    out_specs = (
        pl.BlockSpec((1, S, D), lambda b: (b, 0, 0)),
        pl.BlockSpec((1, n_heads, S, S), lambda b: (b, 0, 0, 0)),
        pl.BlockSpec((1, n_heads, S, S), lambda b: (b, 0, 0, 0)),
    )

    kernel = functools.partial(
        transformer_block_kernel,
        n_heads=n_heads, d_head=d_head, seq_len=S, compute_dtype=compute_dtype,
    )

    return pl.pallas_call(
        kernel,
        out_shape=out_shape,
        grid_spec=pltpu.PrefetchScalarGridSpec(
            num_scalar_prefetch=0,
            grid=(B,),                       # one batch element per step; >= 2 steps
            in_specs=in_specs,
            out_specs=out_specs,
        ),
        compiler_params=pltpu.CompilerParams(
            dimension_semantics=("parallel",),
            vmem_limit_bytes=_vmem_limit_bytes(
                S, D, n_heads, d_head, d_ff, compute_dtype),
        ),
    )(emb, *weights)


def init_params(key, d_model, n_heads, d_head, d_ff):
    d_inner = n_heads * d_head
    ks = jax.random.split(key, 6)
    scale = 0.02

    def lin(k, fan_in, fan_out):
        return scale * jax.random.normal(k, (fan_in, fan_out), jnp.float32)

    return {
        "wq": lin(ks[0], d_model, d_inner), "bq": jnp.zeros((1, d_inner), jnp.float32),
        "wk": lin(ks[1], d_model, d_inner), "bk": jnp.zeros((1, d_inner), jnp.float32),
        "wv": lin(ks[2], d_model, d_inner), "bv": jnp.zeros((1, d_inner), jnp.float32),
        "wo": lin(ks[3], d_inner, d_model), "bo": jnp.zeros((1, d_model), jnp.float32),
        "ln1_w": jnp.ones((1, d_model), jnp.float32),
        "ln1_b": jnp.zeros((1, d_model), jnp.float32),
        "w1": lin(ks[4], d_model, d_ff), "b1": jnp.zeros((1, d_ff), jnp.float32),
        "w2": lin(ks[5], d_ff, d_model), "b2": jnp.zeros((1, d_model), jnp.float32),
        "ln2_w": jnp.ones((1, d_model), jnp.float32),
        "ln2_b": jnp.zeros((1, d_model), jnp.float32),
    }


if __name__ == "__main__":
    # Small, module-consistent shapes.
    batch_size = 2
    seq_len = 8
    d_model = 32
    n_heads = 4
    d_head = 8
    d_ff = 64

    key = jax.random.PRNGKey(0)
    k_emb, k_par = jax.random.split(key)

    emb = jax.random.normal(k_emb, (batch_size, seq_len, d_model), jnp.float32)
    params = init_params(k_par, d_model, n_heads, d_head, d_ff)

    emb_out, attn_weight, attn_score = transformer_block(
        emb, params, n_heads=n_heads, d_head=d_head
    )
    jax.block_until_ready((emb_out, attn_weight, attn_score))

    assert emb_out.shape == (batch_size, seq_len, d_model)
    assert attn_weight.shape == (batch_size, n_heads, seq_len, seq_len)
    assert attn_score.shape == (batch_size, n_heads, seq_len, seq_len)
    assert bool(jnp.all(jnp.isfinite(emb_out)))
    assert bool(jnp.all(jnp.isfinite(attn_weight)))
    assert bool(jnp.all(jnp.isfinite(attn_score)))
    # Softmax rows must sum to ~1 (exact divide in-kernel).
    row_sums = jnp.sum(attn_weight, axis=-1)
    assert bool(jnp.all(jnp.abs(row_sums - 1.0) < 1e-3))

    print("KERNEL_OK")
</pallas_src>

<mosaic_0001>
module attributes {stable_mosaic.version = 11 : i64} {
  func.func @transformer_block_kernel(%arg0: i32, %arg1: memref<1x8x32xf32, #tpu.memory_space<vmem>>, %arg2: memref<32x96xbf16, #tpu.memory_space<vmem>>, %arg3: memref<1x96xf32, #tpu.memory_space<vmem>>, %arg4: memref<32x32xbf16, #tpu.memory_space<vmem>>, %arg5: memref<1x32xf32, #tpu.memory_space<vmem>>, %arg6: memref<1x32xf32, #tpu.memory_space<vmem>>, %arg7: memref<1x32xf32, #tpu.memory_space<vmem>>, %arg8: memref<32x64xbf16, #tpu.memory_space<vmem>>, %arg9: memref<1x64xf32, #tpu.memory_space<vmem>>, %arg10: memref<64x32xbf16, #tpu.memory_space<vmem>>, %arg11: memref<1x32xf32, #tpu.memory_space<vmem>>, %arg12: memref<1x32xf32, #tpu.memory_space<vmem>>, %arg13: memref<1x32xf32, #tpu.memory_space<vmem>>, %arg14: memref<1x8x32xf32, #tpu.memory_space<vmem>>, %arg15: memref<1x4x8x8xf32, #tpu.memory_space<vmem>>, %arg16: memref<1x4x8x8xf32, #tpu.memory_space<vmem>>) attributes {dimension_semantics = [#tpu.dimension_semantics<parallel>], iteration_bounds = array<i64: 2>, scalar_prefetch = 0 : i64, scratch_operands = 0 : i64, tpu.core_type = #tpu.core_type<tc>, window_params = [{transform_indices = @transform_0, window_bounds = array<i64: 1, 8, 32>}, {pipeline_mode = #tpu.pipeline_mode<synchronous>, transform_indices = @transform_1, window_bounds = array<i64: 32, 96>}, {pipeline_mode = #tpu.pipeline_mode<synchronous>, transform_indices = @transform_2, window_bounds = array<i64: 1, 96>}, {pipeline_mode = #tpu.pipeline_mode<synchronous>, transform_indices = @transform_3, window_bounds = array<i64: 32, 32>}, {pipeline_mode = #tpu.pipeline_mode<synchronous>, transform_indices = @transform_4, window_bounds = array<i64: 1, 32>}, {pipeline_mode = #tpu.pipeline_mode<synchronous>, transform_indices = @transform_5, window_bounds = array<i64: 1, 32>}, {pipeline_mode = #tpu.pipeline_mode<synchronous>, transform_indices = @transform_6, window_bounds = array<i64: 1, 32>}, {pipeline_mode = #tpu.pipeline_mode<synchronous>, transform_indices = @transform_7, window_bounds = array<i64: 32, 64>}, {pipeline_mode = #tpu.pipeline_mode<synchronous>, transform_indices = @transform_8, window_bounds = array<i64: 1, 64>}, {pipeline_mode = #tpu.pipeline_mode<synchronous>, transform_indices = @transform_9, window_bounds = array<i64: 64, 32>}, {pipeline_mode = #tpu.pipeline_mode<synchronous>, transform_indices = @transform_10, window_bounds = array<i64: 1, 32>}, {pipeline_mode = #tpu.pipeline_mode<synchronous>, transform_indices = @transform_11, window_bounds = array<i64: 1, 32>}, {pipeline_mode = #tpu.pipeline_mode<synchronous>, transform_indices = @transform_12, window_bounds = array<i64: 1, 32>}, {transform_indices = @transform_13, window_bounds = array<i64: 1, 8, 32>}, {transform_indices = @transform_14, window_bounds = array<i64: 1, 4, 8, 8>}, {transform_indices = @transform_15, window_bounds = array<i64: 1, 4, 8, 8>}]} {
    %c0 = arith.constant 0 : index
    %c0_0 = arith.constant 0 : index
    %c0_1 = arith.constant 0 : index
    %0 = vector.load %arg1[%c0, %c0_0, %c0_1] : memref<1x8x32xf32, #tpu.memory_space<vmem>>, vector<1x8x32xf32>
    %1 = vector.shape_cast %0 : vector<1x8x32xf32> to vector<8x32xf32>
    %2 = arith.truncf %1 : vector<8x32xf32> to vector<8x32xbf16>
    %c0_2 = arith.constant 0 : index
    %c0_3 = arith.constant 0 : index
    %3 = vector.load %arg2[%c0_2, %c0_3] : memref<32x96xbf16, #tpu.memory_space<vmem>>, vector<32x96xbf16>
    %cst = arith.constant dense<0.000000e+00> : vector<8x96xf32>
    %4 = tpu.matmul %2, %3, %cst {dimension_numbers = #tpu.dot_dimension_numbers<[1], [0], [0], [1], [0, 0, 1, 1], [], []>} : vector<8x32xbf16>, vector<32x96xbf16>, vector<8x96xf32> -> vector<8x96xf32>
    %c0_4 = arith.constant 0 : index
    %c0_5 = arith.constant 0 : index
    %5 = vector.load %arg3[%c0_4, %c0_5] : memref<1x96xf32, #tpu.memory_space<vmem>>, vector<1x96xf32>
    %6 = vector.broadcast %5 : vector<1x96xf32> to vector<8x96xf32>
    %7 = arith.addf %4, %6 : vector<8x96xf32>
    %8 = arith.truncf %7 : vector<8x96xf32> to vector<8x96xbf16>
    %9 = vector.extract_strided_slice %8 {offsets = [0, 0], sizes = [8, 32], strides = [1, 1]} : vector<8x96xbf16> to vector<8x32xbf16>
    %10 = vector.extract_strided_slice %8 {offsets = [0, 32], sizes = [8, 32], strides = [1, 1]} : vector<8x96xbf16> to vector<8x32xbf16>
    %11 = vector.extract_strided_slice %8 {offsets = [0, 64], sizes = [8, 32], strides = [1, 1]} : vector<8x96xbf16> to vector<8x32xbf16>
    %12 = vector.shape_cast %9 : vector<8x32xbf16> to vector<8x4x8xbf16>
    %13 = tpu.transpose %12, [1, 0, 2] : vector<8x4x8xbf16> -> vector<4x8x8xbf16>
    %14 = vector.shape_cast %10 : vector<8x32xbf16> to vector<8x4x8xbf16>
    %15 = tpu.transpose %14, [1, 0, 2] : vector<8x4x8xbf16> -> vector<4x8x8xbf16>
    %16 = vector.shape_cast %11 : vector<8x32xbf16> to vector<8x4x8xbf16>
    %17 = tpu.transpose %16, [1, 0, 2] : vector<8x4x8xbf16> -> vector<4x8x8xbf16>
    "tpu.trace_start"() <{level = 10 : i32, message = "hqd,hkd->hqk"}> : () -> ()
    %cst_6 = arith.constant dense<0.000000e+00> : vector<4x8x8xf32>
    %18 = tpu.matmul %13, %15, %cst_6 {dimension_numbers = #tpu.dot_dimension_numbers<[2], [2], [1], [1], [0, 0, 0, 1, 1, 1], [0], [0]>} : vector<4x8x8xbf16>, vector<4x8x8xbf16>, vector<4x8x8xf32> -> vector<4x8x8xf32>
    "tpu.trace_stop"() : () -> ()
    %c0_7 = arith.constant 0 : index
    %c0_8 = arith.constant 0 : index
    %c0_9 = arith.constant 0 : index
    %c0_10 = arith.constant 0 : index
    %19 = vector.load %arg16[%c0_7, %c0_8, %c0_9, %c0_10] : memref<1x4x8x8xf32, #tpu.memory_space<vmem>>, vector<1x4x8x8xf32>
    %20 = vector.shape_cast %19 : vector<1x4x8x8xf32> to vector<4x8x8xf32>
    %21 = vector.shape_cast %18 : vector<4x8x8xf32> to vector<1x4x8x8xf32>
    tpu.vector_store %arg16[%c0_7, %c0_8, %c0_9, %c0_10], %21 {strides = array<i32>} : memref<1x4x8x8xf32, #tpu.memory_space<vmem>>, vector<1x4x8x8xf32>,
    %cst_11 = arith.constant dense<0xFF800000> : vector<4x8xf32>
    %22 = vector.multi_reduction <maximumf>, %18, %cst_11 [2] : vector<4x8x8xf32> to vector<4x8xf32>
    %23 = vector.shape_cast %22 : vector<4x8xf32> to vector<4x8x1xf32>
    %24 = vector.broadcast %23 : vector<4x8x1xf32> to vector<4x8x8xf32>
    %25 = arith.subf %18, %24 : vector<4x8x8xf32>
    %26 = math.exp %25 : vector<4x8x8xf32>
    %cst_12 = arith.constant dense<0.000000e+00> : vector<4x8xf32>
    %27 = vector.multi_reduction <add>, %26, %cst_12 [2] : vector<4x8x8xf32> to vector<4x8xf32>
    %28 = vector.shape_cast %27 : vector<4x8xf32> to vector<4x8x1xf32>
    %29 = vector.broadcast %28 : vector<4x8x1xf32> to vector<4x8x8xf32>
    %30 = arith.divf %26, %29 : vector<4x8x8xf32>
    %c0_13 = arith.constant 0 : index
    %c0_14 = arith.constant 0 : index
    %c0_15 = arith.constant 0 : index
    %c0_16 = arith.constant 0 : index
    %31 = vector.load %arg15[%c0_13, %c0_14, %c0_15, %c0_16] : memref<1x4x8x8xf32, #tpu.memory_space<vmem>>, vector<1x4x8x8xf32>
    %32 = vector.shape_cast %31 : vector<1x4x8x8xf32> to vector<4x8x8xf32>
    %33 = vector.shape_cast %30 : vector<4x8x8xf32> to vector<1x4x8x8xf32>
    tpu.vector_store %arg15[%c0_13, %c0_14, %c0_15, %c0_16], %33 {strides = array<i32>} : memref<1x4x8x8xf32, #tpu.memory_space<vmem>>, vector<1x4x8x8xf32>,
    %34 = arith.truncf %30 : vector<4x8x8xf32> to vector<4x8x8xbf16>
    "tpu.trace_start"() <{level = 10 : i32, message = "hqk,hkd->hqd"}> : () -> ()
    %cst_17 = arith.constant dense<0.000000e+00> : vector<4x8x8xf32>
    %35 = tpu.matmul %34, %17, %cst_17 {dimension_numbers = #tpu.dot_dimension_numbers<[2], [1], [1], [2], [0, 0, 0, 1, 1, 2], [0], [0]>} : vector<4x8x8xbf16>, vector<4x8x8xbf16>, vector<4x8x8xf32> -> vector<4x8x8xf32>
    "tpu.trace_stop"() : () -> ()
    %36 = arith.truncf %35 : vector<4x8x8xf32> to vector<4x8x8xbf16>
    %37 = tpu.transpose %36, [1, 0, 2] : vector<4x8x8xbf16> -> vector<8x4x8xbf16>
    %38 = vector.shape_cast %37 : vector<8x4x8xbf16> to vector<8x32xbf16>
    %c0_18 = arith.constant 0 : index
    %c0_19 = arith.constant 0 : index
    %39 = vector.load %arg4[%c0_18, %c0_19] : memref<32x32xbf16, #tpu.memory_space<vmem>>, vector<32x32xbf16>
    %cst_20 = arith.constant dense<0.000000e+00> : vector<8x32xf32>
    %40 = tpu.matmul %38, %39, %cst_20 {dimension_numbers = #tpu.dot_dimension_numbers<[1], [0], [0], [1], [0, 0, 1, 1], [], []>} : vector<8x32xbf16>, vector<32x32xbf16>, vector<8x32xf32> -> vector<8x32xf32>
    %c0_21 = arith.constant 0 : index
    %c0_22 = arith.constant 0 : index
    %41 = vector.load %arg5[%c0_21, %c0_22] : memref<1x32xf32, #tpu.memory_space<vmem>>, vector<1x32xf32>
    %42 = vector.broadcast %41 : vector<1x32xf32> to vector<8x32xf32>
    %43 = arith.addf %40, %42 : vector<8x32xf32>
    %44 = arith.addf %43, %1 : vector<8x32xf32>
    %c0_23 = arith.constant 0 : index
    %c0_24 = arith.constant 0 : index
    %45 = vector.load %arg6[%c0_23, %c0_24] : memref<1x32xf32, #tpu.memory_space<vmem>>, vector<1x32xf32>
    %c0_25 = arith.constant 0 : index
    %c0_26 = arith.constant 0 : index
    %46 = vector.load %arg7[%c0_25, %c0_26] : memref<1x32xf32, #tpu.memory_space<vmem>>, vector<1x32xf32>
    %cst_27 = arith.constant dense<0.000000e+00> : vector<8xf32>
    %47 = vector.multi_reduction <add>, %44, %cst_27 [1] : vector<8x32xf32> to vector<8xf32>
    %48 = vector.shape_cast %47 : vector<8xf32> to vector<8x1xf32>
    %cst_28 = arith.constant 3.200000e+01 : f32
    %49 = vector.broadcast %cst_28 : f32 to vector<8x1xf32>
    %50 = arith.divf %48, %49 : vector<8x1xf32>
    %51 = vector.broadcast %50 : vector<8x1xf32> to vector<8x32xf32>
    %52 = arith.subf %44, %51 : vector<8x32xf32>
    %53 = arith.mulf %52, %52 : vector<8x32xf32>
    %cst_29 = arith.constant dense<0.000000e+00> : vector<8xf32>
    %54 = vector.multi_reduction <add>, %53, %cst_29 [1] : vector<8x32xf32> to vector<8xf32>
    %55 = vector.shape_cast %54 : vector<8xf32> to vector<8x1xf32>
    %cst_30 = arith.constant 3.200000e+01 : f32
    %56 = vector.broadcast %cst_30 : f32 to vector<8x1xf32>
    %57 = arith.divf %55, %56 : vector<8x1xf32>
    %cst_31 = arith.constant 9.99999974E-6 : f32
    %58 = vector.broadcast %cst_31 : f32 to vector<8x1xf32>
    %59 = arith.addf %57, %58 : vector<8x1xf32>
    %60 = math.rsqrt %59 : vector<8x1xf32>
    %61 = vector.broadcast %60 : vector<8x1xf32> to vector<8x32xf32>
    %62 = arith.mulf %52, %61 : vector<8x32xf32>
    %63 = vector.broadcast %45 : vector<1x32xf32> to vector<8x32xf32>
    %64 = arith.mulf %62, %63 : vector<8x32xf32>
    %65 = vector.broadcast %46 : vector<1x32xf32> to vector<8x32xf32>
    %66 = arith.addf %64, %65 : vector<8x32xf32>
    %67 = arith.truncf %66 : vector<8x32xf32> to vector<8x32xbf16>
    %c0_32 = arith.constant 0 : index
    %c0_33 = arith.constant 0 : index
    %68 = vector.load %arg8[%c0_32, %c0_33] : memref<32x64xbf16, #tpu.memory_space<vmem>>, vector<32x64xbf16>
    %cst_34 = arith.constant dense<0.000000e+00> : vector<8x64xf32>
    %69 = tpu.matmul %67, %68, %cst_34 {dimension_numbers = #tpu.dot_dimension_numbers<[1], [0], [0], [1], [0, 0, 1, 1], [], []>} : vector<8x32xbf16>, vector<32x64xbf16>, vector<8x64xf32> -> vector<8x64xf32>
    %c0_35 = arith.constant 0 : index
    %c0_36 = arith.constant 0 : index
    %70 = vector.load %arg9[%c0_35, %c0_36] : memref<1x64xf32, #tpu.memory_space<vmem>>, vector<1x64xf32>
    %71 = vector.broadcast %70 : vector<1x64xf32> to vector<8x64xf32>
    %72 = arith.addf %69, %71 : vector<8x64xf32>
    %73 = arith.mulf %72, %72 : vector<8x64xf32>
    %74 = arith.mulf %72, %73 : vector<8x64xf32>
    %cst_37 = arith.constant 4.471500e-02 : f32
    %75 = vector.broadcast %cst_37 : f32 to vector<8x64xf32>
    %76 = arith.mulf %75, %74 : vector<8x64xf32>
    %77 = arith.addf %72, %76 : vector<8x64xf32>
    %cst_38 = arith.constant 0.797884583 : f32
    %78 = vector.broadcast %cst_38 : f32 to vector<8x64xf32>
    %79 = arith.mulf %78, %77 : vector<8x64xf32>
    %80 = math.tanh %79 : vector<8x64xf32>
    %cst_39 = arith.constant 1.000000e+00 : f32
    %81 = vector.broadcast %cst_39 : f32 to vector<8x64xf32>
    %82 = arith.addf %81, %80 : vector<8x64xf32>
    %cst_40 = arith.constant 5.000000e-01 : f32
    %83 = vector.broadcast %cst_40 : f32 to vector<8x64xf32>
    %84 = arith.mulf %83, %82 : vector<8x64xf32>
    %85 = arith.mulf %72, %84 : vector<8x64xf32>
    %86 = arith.truncf %85 : vector<8x64xf32> to vector<8x64xbf16>
    %c0_41 = arith.constant 0 : index
    %c0_42 = arith.constant 0 : index
    %87 = vector.load %arg10[%c0_41, %c0_42] : memref<64x32xbf16, #tpu.memory_space<vmem>>, vector<64x32xbf16>
    %cst_43 = arith.constant dense<0.000000e+00> : vector<8x32xf32>
    %88 = tpu.matmul %86, %87, %cst_43 {dimension_numbers = #tpu.dot_dimension_numbers<[1], [0], [0], [1], [0, 0, 1, 1], [], []>} : vector<8x64xbf16>, vector<64x32xbf16>, vector<8x32xf32> -> vector<8x32xf32>
    %c0_44 = arith.constant 0 : index
    %c0_45 = arith.constant 0 : index
    %89 = vector.load %arg11[%c0_44, %c0_45] : memref<1x32xf32, #tpu.memory_space<vmem>>, vector<1x32xf32>
    %90 = vector.broadcast %89 : vector<1x32xf32> to vector<8x32xf32>
    %91 = arith.addf %88, %90 : vector<8x32xf32>
    %92 = arith.addf %91, %66 : vector<8x32xf32>
    %c0_46 = arith.constant 0 : index
    %c0_47 = arith.constant 0 : index
    %93 = vector.load %arg12[%c0_46, %c0_47] : memref<1x32xf32, #tpu.memory_space<vmem>>, vector<1x32xf32>
    %c0_48 = arith.constant 0 : index
    %c0_49 = arith.constant 0 : index
    %94 = vector.load %arg13[%c0_48, %c0_49] : memref<1x32xf32, #tpu.memory_space<vmem>>, vector<1x32xf32>
    %cst_50 = arith.constant dense<0.000000e+00> : vector<8xf32>
    %95 = vector.multi_reduction <add>, %92, %cst_50 [1] : vector<8x32xf32> to vector<8xf32>
    %96 = vector.shape_cast %95 : vector<8xf32> to vector<8x1xf32>
    %cst_51 = arith.constant 3.200000e+01 : f32
    %97 = vector.broadcast %cst_51 : f32 to vector<8x1xf32>
    %98 = arith.divf %96, %97 : vector<8x1xf32>
    %99 = vector.broadcast %98 : vector<8x1xf32> to vector<8x32xf32>
    %100 = arith.subf %92, %99 : vector<8x32xf32>
    %101 = arith.mulf %100, %100 : vector<8x32xf32>
    %cst_52 = arith.constant dense<0.000000e+00> : vector<8xf32>
    %102 = vector.multi_reduction <add>, %101, %cst_52 [1] : vector<8x32xf32> to vector<8xf32>
    %103 = vector.shape_cast %102 : vector<8xf32> to vector<8x1xf32>
    %cst_53 = arith.constant 3.200000e+01 : f32
    %104 = vector.broadcast %cst_53 : f32 to vector<8x1xf32>
    %105 = arith.divf %103, %104 : vector<8x1xf32>
    %cst_54 = arith.constant 9.99999974E-6 : f32
    %106 = vector.broadcast %cst_54 : f32 to vector<8x1xf32>
    %107 = arith.addf %105, %106 : vector<8x1xf32>
    %108 = math.rsqrt %107 : vector<8x1xf32>
    %109 = vector.broadcast %108 : vector<8x1xf32> to vector<8x32xf32>
    %110 = arith.mulf %100, %109 : vector<8x32xf32>
    %111 = vector.broadcast %93 : vector<1x32xf32> to vector<8x32xf32>
    %112 = arith.mulf %110, %111 : vector<8x32xf32>
    %113 = vector.broadcast %94 : vector<1x32xf32> to vector<8x32xf32>
    %114 = arith.addf %112, %113 : vector<8x32xf32>
    %c0_55 = arith.constant 0 : index
    %c0_56 = arith.constant 0 : index
    %c0_57 = arith.constant 0 : index
    %115 = vector.load %arg14[%c0_55, %c0_56, %c0_57] : memref<1x8x32xf32, #tpu.memory_space<vmem>>, vector<1x8x32xf32>
    %116 = vector.shape_cast %115 : vector<1x8x32xf32> to vector<8x32xf32>
    %117 = vector.shape_cast %114 : vector<8x32xf32> to vector<1x8x32xf32>
    tpu.vector_store %arg14[%c0_55, %c0_56, %c0_57], %117 {strides = array<i32>} : memref<1x8x32xf32, #tpu.memory_space<vmem>>, vector<1x8x32xf32>,
    return
  }
  func.func @transform_0(%arg0: i32) -> (i32, i32, i32) {
    %c0_i32 = arith.constant 0 : i32
    %c0_i32_0 = arith.constant 0 : i32
    %c0_i32_1 = arith.constant 0 : i32
    return %arg0, %c0_i32, %c0_i32_0 : i32, i32, i32
  }
  func.func @transform_1(%arg0: i32) -> (i32, i32) {
    %c0_i32 = arith.constant 0 : i32
    %c0_i32_0 = arith.constant 0 : i32
    %c0_i32_1 = arith.constant 0 : i32
    return %c0_i32, %c0_i32_0 : i32, i32
  }
  func.func @transform_2(%arg0: i32) -> (i32, i32) {
    %c0_i32 = arith.constant 0 : i32
    %c0_i32_0 = arith.constant 0 : i32
    %c0_i32_1 = arith.constant 0 : i32
    return %c0_i32, %c0_i32_0 : i32, i32
  }
  func.func @transform_3(%arg0: i32) -> (i32, i32) {
    %c0_i32 = arith.constant 0 : i32
    %c0_i32_0 = arith.constant 0 : i32
    %c0_i32_1 = arith.constant 0 : i32
    return %c0_i32, %c0_i32_0 : i32, i32
  }
  func.func @transform_4(%arg0: i32) -> (i32, i32) {
    %c0_i32 = arith.constant 0 : i32
    %c0_i32_0 = arith.constant 0 : i32
    %c0_i32_1 = arith.constant 0 : i32
    return %c0_i32, %c0_i32_0 : i32, i32
  }
  func.func @transform_5(%arg0: i32) -> (i32, i32) {
    %c0_i32 = arith.constant 0 : i32
    %c0_i32_0 = arith.constant 0 : i32
    %c0_i32_1 = arith.constant 0 : i32
    return %c0_i32, %c0_i32_0 : i32, i32
  }
  func.func @transform_6(%arg0: i32) -> (i32, i32) {
    %c0_i32 = arith.constant 0 : i32
    %c0_i32_0 = arith.constant 0 : i32
    %c0_i32_1 = arith.constant 0 : i32
    return %c0_i32, %c0_i32_0 : i32, i32
  }
  func.func @transform_7(%arg0: i32) -> (i32, i32) {
    %c0_i32 = arith.constant 0 : i32
    %c0_i32_0 = arith.constant 0 : i32
    %c0_i32_1 = arith.constant 0 : i32
    return %c0_i32, %c0_i32_0 : i32, i32
  }
  func.func @transform_8(%arg0: i32) -> (i32, i32) {
    %c0_i32 = arith.constant 0 : i32
    %c0_i32_0 = arith.constant 0 : i32
    %c0_i32_1 = arith.constant 0 : i32
    return %c0_i32, %c0_i32_0 : i32, i32
  }
  func.func @transform_9(%arg0: i32) -> (i32, i32) {
    %c0_i32 = arith.constant 0 : i32
    %c0_i32_0 = arith.constant 0 : i32
    %c0_i32_1 = arith.constant 0 : i32
    return %c0_i32, %c0_i32_0 : i32, i32
  }
  func.func @transform_10(%arg0: i32) -> (i32, i32) {
    %c0_i32 = arith.constant 0 : i32
    %c0_i32_0 = arith.constant 0 : i32
    %c0_i32_1 = arith.constant 0 : i32
    return %c0_i32, %c0_i32_0 : i32, i32
  }
  func.func @transform_11(%arg0: i32) -> (i32, i32) {
    %c0_i32 = arith.constant 0 : i32
    %c0_i32_0 = arith.constant 0 : i32
    %c0_i32_1 = arith.constant 0 : i32
    return %c0_i32, %c0_i32_0 : i32, i32
  }
  func.func @transform_12(%arg0: i32) -> (i32, i32) {
    %c0_i32 = arith.constant 0 : i32
    %c0_i32_0 = arith.constant 0 : i32
    %c0_i32_1 = arith.constant 0 : i32
    return %c0_i32, %c0_i32_0 : i32, i32
  }
  func.func @transform_13(%arg0: i32) -> (i32, i32, i32) {
    %c0_i32 = arith.constant 0 : i32
    %c0_i32_0 = arith.constant 0 : i32
    %c0_i32_1 = arith.constant 0 : i32
    return %arg0, %c0_i32, %c0_i32_0 : i32, i32, i32
  }
  func.func @transform_14(%arg0: i32) -> (i32, i32, i32, i32) {
    %c0_i32 = arith.constant 0 : i32
    %c0_i32_0 = arith.constant 0 : i32
    %c0_i32_1 = arith.constant 0 : i32
    %c0_i32_2 = arith.constant 0 : i32
    return %arg0, %c0_i32, %c0_i32_0, %c0_i32_1 : i32, i32, i32, i32
  }
  func.func @transform_15(%arg0: i32) -> (i32, i32, i32, i32) {
    %c0_i32 = arith.constant 0 : i32
    %c0_i32_0 = arith.constant 0 : i32
    %c0_i32_1 = arith.constant 0 : i32
    %c0_i32_2 = arith.constant 0 : i32
    return %arg0, %c0_i32, %c0_i32_0, %c0_i32_1 : i32, i32, i32, i32
  }
}

</mosaic_0001>

<bundles_post_ra>
// kernel: tpu_custom_call.1
= control target key start
LH: loop header
LB: loop body
LE: loop exit
PB: predicated region body
PF: predicated region fallthrough
CT: control target
= control target key end

     0   :  { %s2603_s0 = inlined_call_operand.vmem [shape: f32[2,8,32], index: 0, kind: input, shape index: {}]   ;;  %s2604_s1 = inlined_call_operand.vmem [shape: bf16[32,96], index: 1, kind: input, shape index: {}]   ;;  %s2605_s2 = inlined_call_operand.vmem [shape: f32[1,96], index: 2, kind: input, shape index: {}]   ;;  %s2606_s3 = inlined_call_operand.vmem [shape: bf16[32,32], index: 3, kind: input, shape index: {}]   ;;  %s2607_s4 = inlined_call_operand.vmem [shape: f32[1,32], index: 4, kind: input, shape index: {}]   ;;  %s2608_s5 = inlined_call_operand.vmem [shape: f32[1,32], index: 5, kind: input, shape index: {}]   ;;  %s2609_s6 = inlined_call_operand.vmem [shape: f32[1,32], index: 6, kind: input, shape index: {}]   ;;  %s2610_s7 = inlined_call_operand.hbm [shape: bf16[32,64], index: 7, kind: input, shape index: {}]   ;;  %s2611_s8 = inlined_call_operand.vmem [shape: f32[1,64], index: 8, kind: input, shape index: {}]   ;;  %s2612_s9 = inlined_call_operand.vmem [shape: bf16[64,32], index: 9, kind: input, shape index: {}]   ;;  %s2613_s10 = inlined_call_operand.vmem [shape: f32[1,32], index: 10, kind: input, shape index: {}]   ;;  %s2614_s11 = inlined_call_operand.vmem [shape: f32[1,32], index: 11, kind: input, shape index: {}]   ;;  %s2615_s12 = inlined_call_operand.vmem [shape: f32[1,32], index: 12, kind: input, shape index: {}]   ;;  %s2616_s13 = inlined_call_operand.hbm [shape: f32[2,8,32], index: 13, kind: output, shape index: {0}]   ;;  %s2617_s14 = inlined_call_operand.hbm [shape: f32[2,4,8,8], index: 14, kind: output, shape index: {1}]   ;;  %s2618_s15 = inlined_call_operand.hbm [shape: f32[2,4,8,8], index: 15, kind: output, shape index: {2}]  }
   0x1   :  { %2626 = sst [smem:[#allocation16_spill]] %s2603_s0 }
   0x2   :  { %2627 = sst [smem:[#allocation17_spill]] %s2604_s1 }
   0x3   :  { %2628 = sst [smem:[#allocation18_spill]] %s2605_s2 }
   0x4   :  { %2629 = sst [smem:[#allocation19_spill]] %s2606_s3 }
   0x5   :  { %2630 = sst [smem:[#allocation20_spill]] %s2607_s4 }
   0x6   :  { %2631 = sst [smem:[#allocation21_spill]] %s2608_s5 }
   0x7   :  { %2632 = sst [smem:[#allocation22_spill]] %s2610_s7 }
   0x8   :  { %21 = vsyncpa [#allocation3], 0 }
   0x9   :  { %22 = vsyncpa [#allocation4], 0 }
   0xa   :  { %24 = vsyncpa [#allocation4 + $0x1], 0 }
   0xb   :  { %25 = vsyncpa [#allocation7], 0 }
   0xc   :  { %27 = vsyncpa [#allocation7 + $0x1], 0  ;;  %s2179_s18 = smov 0   ;;  %s2181_s19 = smov 0  }
   0xd   :  { %s2183_s20 = smov 0   ;;  %s2185_s21 = smov 0  }
   0xe LB: > { %2633 = sst [smem:[#allocation12_spill]] %s2078_s20  ;;  %s2200_s22 = sadd.s32 4294967295, %s2082_s21   ;;  %s2082_s21 = sphi %s2185_s21, %s2649_s21   ;;  %s2078_s20 = sphi %s2183_s20, %s2651_s20   ;;  %s2074_s19 = sphi %s2181_s19, %s2653_s19   ;;  %s2070_s18 = sphi %s2179_s18, %s2652_s18  }
   0xf   : > { %s2619_s23 = sadd.s32 4294967294, %s2082_s21   ;;  %s2204_s24 = sadd.s32 1, %s2082_s21  }
  0x10   : > { %2634 = sst [smem:[#allocation13_spill]] %s2204_s24  ;;  %s318_s25 = sadd.s32 1, %s2078_s20 }
  0x11   : > { %s315_s26 = ssub.s32 %s2082_s21, %s2204_s24  ;;  %p328_p0 = scmp.ne.s32.totalorder %s2078_s20, %s2074_s19 }
  0x12   : > { %p316_p1 = scmp.eq.s32.totalorder %s315_s26, 0  ;;  %p329_p2 = scmp.eq.s32.totalorder %s2200_s22, 1 }
  0x13   : > { %p334_p3 = scmp.ne.s32.totalorder %s2074_s19, %s2070_s18  ;;  %p335_p4 = scmp.eq.s32.totalorder %s2619_s23, 1 }
  0x14   : > { %s2217_s27 = scalar_select %p316_p1, %s2078_s20, %s318_s25  }
  0x15   : > { %p2219_p5 = por %p329_p2, %p328_p0  ;;  %p2223_p6 = por %p335_p4, %p334_p3 }
  0x16   : > { %2635 = sst [smem:[#allocation14_spill]] %s2217_s27  ;;  %p1737_p7 = scmp.ge.s32.totalorder %s2082_s21, 1 }
  0x17   : > { %s2637_s29 = scalar_select %p2223_p6, 1, 0 }
  0x18   : > { %p394_p8 = scmp.lt.s32.totalorder %s2082_s21, 3  ;;  %p1844_p9 = scmp.eq.s32.totalorder %s2200_s22, 0 }
  0x19   : > { %2638 = sst [smem:[#allocation15_spill]] %s2637_s29  ;;  %s2084_s25 = smov [#allocation2]  }
  0x1a   : > { %p395_p10 = pnand %p1737_p7, %p394_p8  ;;  %s2639_s7 = sld [smem:[#allocation22_spill]] }
  0x1b   : > { %s425_s26 = sshll.u32 %s2084_s25, 4  ;;  %s2085_s23 = smov 64   ;;  %s426_s26 = int_to_ptr.vmem [resolvable:$true] %s425_s26 }
  0x1c   : > { %p1830_p11 = pneg %p395_p10  ;;  %s2086_s27 = smov 4  }
  0x1d   : > { %463 = sbr.rel (%p395_p10) target bundleno = 2096 (0x830), region = 72 }
  0x1e   : > { %p1831_p12 = pnand %p1844_p9, %p1830_p11 }
  0x20   : > { %s423_s17 = sshll.u32 %s2639_s7, 4  ;;  %s424_s17 = int_to_ptr.hbm [resolvable:$true] %s423_s17 }
  0x21   : > { %1833 = dma.hbm_to_vmem [thread:$0]  (!%p1831_p12), %s424_s17, 256, %s426_s26, [#allocation3], %s2085_s23, %s2085_s23, %s2086_s27  }
  0x22   : > { %2057 = dma.done.wait (%p1844_p9), [#allocation3], 256  }
  0x23   : > { %2059 = vsyncadd (%p1844_p9), [#allocation3], 4294967040  ;;  %p521_p13 = scmp.lt.s32.totalorder %s2200_s22, 1  ;;  %s2640_s0 = sld [smem:[#allocation16_spill]]  ;;  %vm548_vm0 = vcmask 261120   ;;  %vm596_vm1 = vcmask 1047556  }
  0x24   : > { %s2641_s1 = sld [smem:[#allocation17_spill]]  ;;  %s2087_s24 = smov 104   ;;  %v2092_v13 = vmov 1983009808   ;;  %v2093_v25 = vmov 1934713408  }
  0x25   : > { %s522_s30 = scalar_select %p521_p13, %s2200_s22, 1  ;;  %v587_v14 = vunpack.c.l.s4 %v2092_v13  ;;  %v601_v26 = vunpack.c.l.s4 %v2093_v25  ;;  %vm932_vm2 = vcmask 64512   ;;  %vm1120_vm3 = vcmask 1043456  }
  0x26   : > { %s2642_s2 = sld [smem:[#allocation18_spill]]  ;;  %s2088_s29 = smov 120  }
  0x27   : > { %s1745_s16 = sshll.u32 %s522_s30, 3  ;;  %s2090_s26 = smov 112   ;;  %v2271_v19 = vunpack.c.0.s8 %v587_v14  ;;  %v2280_v31 = vunpack.c.0.s8 %v601_v26 }
  0x28   : > { %s2091_s30 = smov 64   ;;  %s2624_s7 = smov 8  }
  0x29   : > { %s524_s20 = scalar_lea.vmem %s2640_s0, %s1745_s16  ;;  %s2347_s16 = sand.u32 1, %s2074_s19  }
  0x2a   : > { %v1809_v0 = vld [vmem:[%s2641_s1 + $0x8] sm:$0xff]  ;;  %v1808_v1 = vld [vmem:[%s2641_s1] sm:$0xff]  ;;  %s1743_s25 = sshll.u32 %s2347_s16, 5  ;;  %s2095_s17 = smov 16  }
  0x2b   : > { %v2250_v2 = vld [vmem:[%s524_s20] sm:$0xff]  ;;  %558 = vmatpush.bf16.msra.mxu0 %v1809_v0  ;;  %s2089_s20 = smov 96   ;;  %s2352_s23 = scalar_lea.vmem [#allocation8], %s1743_s25 }
  0x2c   : > { %v527_v3 = vpack.c.bf16 %v2250_v2, %v2250_v2  ;;  %v1894_v4 = vld [vmem:[%s2642_s2] ss:$0 sm:$0xff]  ;;  %s2425_s27 = scalar_lea.vmem [#allocation6], %s1743_s25  ;;  %s2643_s3 = sld [smem:[#allocation19_spill]] }
  0x2d   : > { %s2644_s4 = sld [smem:[#allocation20_spill]]  ;;  %s1579_s1 = sshll.u32 %s2425_s27, 4  ;;  %s1580_s1 = int_to_ptr.vmem [resolvable:$true] %s1579_s1 }
  0x2e   : > { %s2645_s5 = sld [smem:[#allocation21_spill]]  ;;  %s1818_s25 = sshll.u32 %s2200_s22, 5 }
  0x2f   : > { %559 = vmatpush.bf16.msra.mxu0 %v1808_v1  ;;  %s1595_s0 = scalar_lea.hbm %s2618_s15, %s1818_s25 }
  0x32   : > { %1754 = vmatmul.msk.bf16.vlgmr.msra.gmra.mxu0 %vm548_vm0, %v527_v3 }
  0xaf   : > { %v561_v5 = vpop.f32.mrf.mxu0 }
  0xb0   : > { %v562_v6 = vadd.f32 %v1894_v4, %v561_v5 }
  0xb2   : > { %v565_v7 = vpack.c.bf16 %v562_v6, %v562_v6 }
  0xb4   : > { %571 = vrot.lane.b32.xlu1 %v565_v7, %s2087_s24  ;;  %567 = vrot.lane.b32.xlu0 %v565_v7, %s2088_s29  ;;  %v576_v15 = vshrl.u32 %v565_v7, 16  ;;  %s2096_s24 = smov 24   ;;  %s1578_s29 = scalar_lea.hbm %s2617_s14, %s1818_s25 }
  0xb7   : > { %v563_v8 = vpop.f32.mrf.mxu0 }
  0xbc   : > { %688 = vrot.lane.b32.xlu1 %v565_v7, %s2089_s20  ;;  %569 = vrot.lane.b32.xlu0 %v565_v7, %s2090_s26 }
  0xc4   : > { %810 = vrot.lane.b32.xlu1 %v565_v7, %s2091_s30 }
 0x126   : > { %v2259_v9 = vpop.permute.xlu1 %571  ;;  %v2261_v10 = vpop.permute.xlu0 %567 }
 0x127   : > { %694 = vrot.lane.b32.xlu0 %v2259_v9, %s2089_s20  ;;  %690 = vrot.lane.b32.xlu2 %v2261_v10, %s2089_s20  ;;  %v577_v12 = vshrl.u32 %v2261_v10, 16  ;;  %v583_v17 = vshrl.u32 %v2259_v9, 16  ;;  %v575_v20 = vpack.i.b16 %v2261_v10, %v565_v7 }
 0x129   : > { %v578_v18 = vpack.i.b16 %v577_v12, %v576_v15  ;;  %v589_v24 = vperm.slane %v575_v20, %v2271_v19 }
 0x12b   : > { %v616_v23 = vperm.slane %v578_v18, %v2271_v19  ;;  %v598_v30 = vrot.slane %v589_v24, 4 }
 0x12d   : > { %v624_v29 = vrot.slane %v616_v23, 4 }
 0x12e   : > { %v2265_v11 = vpop.permute.xlu0 %569  ;;  %v689_v38 = vpop.permute.xlu1 %688 }
 0x12f   : > { %692 = vrot.lane.b32.xlu2 %v2265_v11, %s2089_s20  ;;  %v582_v16 = vshrl.u32 %v2265_v11, 16  ;;  %v581_v22 = vpack.i.b16 %v2259_v9, %v2265_v11  ;;  %v699_v43 = vshrl.u32 %v689_v38, 16  ;;  %s1581_s20 = sshll.u32 %s1578_s29, 4  ;;  %s1582_s20 = int_to_ptr.hbm [resolvable:$true] %s1581_s20 }
 0x131   : > { %v584_v21 = vpack.i.b16 %v583_v17, %v582_v16  ;;  %v594_v28 = vperm.slane %v581_v22, %v2271_v19 }
 0x133   : > { %v621_v27 = vperm.slane %v584_v21, %v2271_v19  ;;  %v595_v35 = vrot.slane %v594_v28, 4  ;;  %v599_v36 = vsel %vm596_vm1, %v594_v28, %v598_v30 }
 0x134   : > { %v607_v39 = vperm.slane %v599_v36, %v2280_v31 }
 0x135   : > { %v622_v32 = vrot.slane %v621_v27, 4  ;;  %v625_v33 = vsel %vm596_vm1, %v621_v27, %v624_v29  ;;  %v597_v41 = vsel %vm596_vm1, %v595_v35, %v589_v24 }
 0x136   : > { %v633_v37 = vperm.slane %v625_v33, %v2280_v31  ;;  %v603_v47 = vperm.slane %v597_v41, %v2280_v31  ;;  %v610_v48 = vrot.slane %v607_v39, 4 }
 0x137   : > { %v623_v40 = vsel %vm596_vm1, %v622_v32, %v616_v23 }
 0x138   : > { %v629_v44 = vperm.slane %v623_v40, %v2280_v31  ;;  %v636_v45 = vrot.slane %v633_v37, 4  ;;  %v608_v54 = vrot.slane %v603_v47, 4  ;;  %v611_v55 = vsel %vm596_vm1, 0, %v610_v48 }
 0x139   : > { %v643_v3 = vrot.slane %v611_v55, 4  ;;  %v638_v40 = vsel %vm596_vm1, %v610_v48, %v603_v47 }
 0x13a   : > { %v634_v51 = vrot.slane %v629_v44, 4  ;;  %v637_v52 = vsel %vm596_vm1, 0, %v636_v45  ;;  %v609_v4 = vsel %vm596_vm1, 0, %v608_v54  ;;  %v657_v37 = vsel %vm596_vm1, %v636_v45, %v629_v44 }
 0x13b   : > { %v662_v61 = vrot.slane %v637_v52, 4  ;;  %v644_v21 = vsel %vm596_vm1, %v643_v3, %v609_v4  ;;  %v661_v52 = vperm.slane %v657_v37, %v2271_v19  ;;  %v642_v44 = vperm.slane %v638_v40, %v2271_v19 }
 0x13c   : > { %v635_v1 = vsel %vm596_vm1, 0, %v634_v51  ;;  %v648_v29 = vperm.slane %v644_v21, %v2271_v19 }
 0x13d   : > { %v663_v13 = vsel %vm596_vm1, %v662_v61, %v635_v1 }
 0x13e   : > { %v667_v23 = vperm.slane %v663_v13, %v2271_v19 }
 0x140   : > { %v668_v41 = vrot.slane %v667_v23, 4 }
 0x142   : > { %v669_v48 = vsel %vm596_vm1, %v668_v41, %v661_v52 }
 0x181   : > { %v691_v34 = vpop.permute.xlu2 %690 }
 0x182   : > { %v700_v42 = vshrl.u32 %v691_v34, 16  ;;  %v698_v46 = vpack.i.b16 %v691_v34, %v689_v38 }
 0x184   : > { %v701_v49 = vpack.i.b16 %v700_v42, %v699_v43  ;;  %v712_v53 = vperm.slane %v698_v46, %v2271_v19  ;;  %v649_v46 = vrot.slane %v648_v29, 4 }
 0x186   : > { %v738_v57 = vperm.slane %v701_v49, %v2271_v19  ;;  %v720_v62 = vrot.slane %v712_v53, 4  ;;  %v650_v55 = vsel %vm596_vm1, %v649_v46, %v642_v44 }
 0x187   : > { %v654_v61 = vperm.slane %v650_v55, %v2280_v31 }
 0x188   : > { %v746_v5 = vrot.slane %v738_v57, 4 }
 0x189   : > { %v693_v50 = vpop.permute.xlu2 %692 }
 0x18a   : > { %v705_v58 = vshrl.u32 %v693_v50, 16 }
 0x199   : > { %v695_v56 = vpop.permute.xlu0 %694 }
 0x19a   : > { %v704_v59 = vpack.i.b16 %v695_v56, %v693_v50  ;;  %v706_v60 = vshrl.u32 %v695_v56, 16 }
 0x19c   : > { %v707_v63 = vpack.i.b16 %v706_v60, %v705_v58  ;;  %v717_v0 = vperm.slane %v704_v59, %v2271_v19  ;;  %v673_v59 = vperm.slane %v669_v48, %v2280_v31 }
 0x19e   : > { %v718_v6 = vrot.slane %v717_v0, 4  ;;  %v721_v7 = vsel %vm596_vm1, %v717_v0, %v720_v62  ;;  %v743_v8 = vperm.slane %v707_v63, %v2271_v19  ;;  %v678_v21 = vpack.i.b16 %v673_v59, %v654_v61 }
 0x19f   : > { %v729_v12 = vperm.slane %v721_v7, %v2280_v31 }
 0x1a0   : > { %v719_v14 = vsel %vm596_vm1, %v718_v6, %v712_v53  ;;  %v744_v15 = vrot.slane %v743_v8, 4  ;;  %v747_v16 = vsel %vm596_vm1, %v743_v8, %v746_v5  ;;  %v674_v6 = vrot.slane %v673_v59, 4 }
 0x1a1   : > { %v725_v17 = vperm.slane %v719_v14, %v2280_v31  ;;  %v732_v18 = vrot.slane %v729_v12, 4  ;;  %v755_v20 = vperm.slane %v747_v16, %v2280_v31  ;;  %v655_v14 = vrot.slane %v654_v61, 4 }
 0x1a2   : > { %v745_v22 = vsel %vm596_vm1, %v744_v15, %v738_v57 }
 0x1a3   : > { %v730_v24 = vrot.slane %v725_v17, 4  ;;  %v733_v25 = vsel %vm596_vm1, 0, %v732_v18  ;;  %v751_v26 = vperm.slane %v745_v22, %v2280_v31  ;;  %v758_v27 = vrot.slane %v755_v20, 4 }
 0x1a4   : > { %v765_v28 = vrot.slane %v733_v25, 4  ;;  %v760_v35 = vsel %vm596_vm1, %v732_v18, %v725_v17  ;;  %v680_v17 = vshrl.u32 %v673_v59, 16  ;;  %v675_v18 = vsel %vm596_vm1, 0, %v674_v6 }
 0x1a5   : > { %v731_v30 = vsel %vm596_vm1, 0, %v730_v24  ;;  %v756_v32 = vrot.slane %v751_v26, 4  ;;  %v759_v33 = vsel %vm596_vm1, 0, %v758_v27  ;;  %v779_v42 = vsel %vm596_vm1, %v758_v27, %v751_v26 }
 0x1a6   : > { %v784_v34 = vrot.slane %v759_v33, 4  ;;  %v766_v36 = vsel %vm596_vm1, %v765_v28, %v731_v30  ;;  %v764_v49 = vperm.slane %v760_v35, %v2271_v19  ;;  %v783_v53 = vperm.slane %v779_v42, %v2271_v19  ;;  %v811_v42 = vpop.permute.xlu1 %810 }
 0x1a7   : > { %v757_v38 = vsel %vm596_vm1, 0, %v756_v32  ;;  %v770_v39 = vperm.slane %v766_v36, %v2271_v19  ;;  %v679_v22 = vshrl.u32 %v654_v61, 16  ;;  %v656_v23 = vsel %vm596_vm1, 0, %v655_v14 }
 0x1a8   : > { %v785_v43 = vsel %vm596_vm1, %v784_v34, %v757_v38  ;;  %v686_v24 = vshrl.u32 %v675_v18, 16  ;;  %v684_v26 = vpack.i.b16 %v675_v18, %v656_v23  ;;  %v685_v27 = vshrl.u32 %v656_v23, 16 }
 0x1a9   : > { %v771_v50 = vrot.slane %v770_v39, 4  ;;  %v789_v51 = vperm.slane %v785_v43, %v2271_v19  ;;  %v681_v25 = vpack.i.b16 %v680_v17, %v679_v22  ;;  %v821_v61 = vshrl.u32 %v811_v42, 16 }
 0x1aa   : > { %v687_v28 = vpack.i.b16 %v686_v24, %v685_v27 }
 0x1ab   : > { %v772_v45 = vsel %vm596_vm1, %v771_v50, %v764_v49  ;;  %v790_v47 = vrot.slane %v789_v51, 4 }
 0x1ac   : > { %v776_v54 = vperm.slane %v772_v45, %v2280_v31 }
 0x1ad   : > { %v791_v56 = vsel %vm596_vm1, %v790_v47, %v783_v53 }
 0x1ae   : > { %v795_v57 = vperm.slane %v791_v56, %v2280_v31  ;;  %v777_v58 = vrot.slane %v776_v54, 4  ;;  %v801_v60 = vshrl.u32 %v776_v54, 16 }
 0x1b0   : > { %v800_v62 = vpack.i.b16 %v795_v57, %v776_v54  ;;  %v802_v63 = vshrl.u32 %v795_v57, 16  ;;  %v778_v0 = vsel %vm596_vm1, 0, %v777_v58  ;;  %v796_v1 = vrot.slane %v795_v57, 4 }
 0x1b1   : > { %v807_v8 = vshrl.u32 %v778_v0, 16 }
 0x1b2   : > { %v937_v3 = vsel %vm932_vm2, %v800_v62, 0  ;;  %v803_v4 = vpack.i.b16 %v802_v63, %v801_v60  ;;  %v797_v5 = vsel %vm596_vm1, 0, %v796_v1 }
 0x1b3   : > { %946 = vmatpush.bf16.xpose.msra.mxu1 %v937_v3  ;;  %v806_v7 = vpack.i.b16 %v797_v5, %v778_v0  ;;  %v808_v12 = vshrl.u32 %v797_v5, 16 }
 0x1b4   : > { %v956_v13 = vsel %vm932_vm2, %v803_v4, 0 }
 0x1b5   : > { %965 = vmatpush.bf16.xpose.msra.mxu2 %v956_v13  ;;  %v975_v15 = vsel %vm932_vm2, %v806_v7, 0  ;;  %v809_v16 = vpack.i.b16 %v808_v12, %v807_v8 }
 0x1b6   : > { %984 = vmatpush.bf16.xpose.msra.mxu3 %v975_v15 }
 0x1b7   : > { %v994_v20 = vsel %vm932_vm2, %v809_v16, 0 }
 0x1b8   : > { %1003 = vmatpush.bf16.xpose.msrb.mxu0 %v994_v20 }
 0x1ba   : > { %1755 = vmatmul.msk.bf16.vlgmr.msra.gmra.mxu1 %vm932_vm2, %v678_v21 }
 0x1bc   : > { %1756 = vmatmul.msk.bf16.vlgmr.msra.gmra.mxu2 %vm932_vm2, %v681_v25 }
 0x1bd   : > { %1757 = vmatmul.msk.bf16.vlgmr.msra.gmra.mxu3 %vm932_vm2, %v684_v26 }
 0x1bf   : > { %1758 = vmatmul.msk.bf16.vlgmr.msrb.gmra.mxu0 %vm932_vm2, %v687_v28 }
 0x237   : > { %v948_v29 = vpop.f32.mrf.mxu1 }
 0x238   : > { %1009 = vst.msk [vmem:[%s2352_s23] sm:$0xff] %vm932_vm2, %v948_v29  ;;  %v1013_v30 = vsel %vm932_vm2, %v948_v29, -inf }
 0x239   : > { %1014 = vmax.xlane.f32.xlu0 %v1013_v30 }
 0x23c   : > { %v1005_v32 = vpop.f32.mrf.mxu0 }
 0x23d   : > { %1012 = vst.msk [vmem:[%s2352_s23 + $0x18] sm:$0xff] %vm932_vm2, %v1005_v32  ;;  %v1022_v33 = vsel %vm932_vm2, %v1005_v32, -inf }
 0x23e   : > { %1023 = vmax.xlane.f32.xlu2 %v1022_v33 }
 0x23f   : > { %v950_v34 = vpop.f32.mrf.mxu1  ;;  %v967_v35 = vpop.f32.mrf.mxu2 }
 0x240   : > { %1010 = vst.msk [vmem:[%s2352_s23 + $0x8] sm:$0xff] %vm932_vm2, %v967_v35  ;;  %v986_v36 = vpop.f32.mrf.mxu3  ;;  %v1016_v37 = vsel %vm932_vm2, %v967_v35, -inf }
 0x241   : > { %1011 = vst.msk [vmem:[%s2352_s23 + $0x10] sm:$0xff] %vm932_vm2, %v986_v36  ;;  %1017 = vmax.xlane.f32.xlu1 %v1016_v37  ;;  %v1019_v39 = vsel %vm932_vm2, %v986_v36, -inf }
 0x244   : > { %v1007_v38 = vpop.f32.mrf.mxu0 }
 0x246   : > { %1020 = vmax.xlane.f32.xlu2 %v1019_v39 }
 0x247   : > { %v969_v40 = vpop.f32.mrf.mxu2 }
 0x248   : > { %v988_v41 = vpop.f32.mrf.mxu3 }
 0x24d   : > { %814 = vrot.lane.b32.xlu0 %v2265_v11, %s2091_s30 }
 0x25a   : > { %816 = vrot.lane.b32.xlu1 %v2259_v9, %s2091_s30 }
 0x25e   : > { %812 = vrot.lane.b32.xlu2 %v2261_v10, %s2091_s30  ;;  %s1547_s30 = sand.u32 1, %s2200_s22  }
 0x25f   : > { %s2532_s2 = scalar_lea.sflag [#allocation7], %s1547_s30 }
 0x2ac   : > { %v1015_v43 = vpop.xlane.xlu0 %1014 }
 0x2ad   : > { %v1025_v46 = vsub.f32 %v948_v29, %v1015_v43 }
 0x2af   : > { %v1029_v49 = vmul.f32 1.442695, %v1025_v46 }
 0x2b1   : > { %1902 = vpow2.f32 %v1029_v49  ;;  %v1024_v50 = vpop.xlane.xlu2 %1023 }
 0x2b2   : > { %v1028_v45 = vsub.f32 %v1005_v32, %v1024_v50 }
 0x2b4   : > { %v1018_v51 = vpop.xlane.xlu1 %1017  ;;  %v1035_v10 = vmul.f32 1.442695, %v1028_v45 }
 0x2b5   : > { %v1026_v52 = vsub.f32 %v967_v35, %v1018_v51 }
 0x2b7   : > { %v2372_v44 = vpop.eup %1902  ;;  %v1031_v53 = vmul.f32 1.442695, %v1026_v52 }
 0x2b8   : > { %v1037_v11 = vsel %vm932_vm2, %v2372_v44, 0.0 }
 0x2b9   : > { %1904 = vpow2.f32 %v1031_v53  ;;  %1038 = vadd.xlane.f32.xlu1 %v1037_v11  ;;  %v1021_v9 = vpop.xlane.xlu2 %1020 }
 0x2ba   : > { %v1027_v47 = vsub.f32 %v986_v36, %v1021_v9 }
 0x2bc   : > { %v1033_v48 = vmul.f32 1.442695, %v1027_v47 }
 0x2be   : > { %1906 = vpow2.f32 %v1033_v48 }
 0x2bf   : > { %v2376_v54 = vpop.eup %1904  ;;  %1908 = vpow2.f32 %v1035_v10  ;;  %v815_v1 = vpop.permute.xlu0 %814 }
 0x2c0   : > { %v1040_v55 = vsel %vm932_vm2, %v2376_v54, 0.0  ;;  %v827_v5 = vshrl.u32 %v815_v1, 16 }
 0x2c1   : > { %1041 = vadd.xlane.f32.xlu0 %v1040_v55  ;;  %v813_v56 = vpop.permute.xlu2 %812 }
 0x2c2   : > { %v822_v59 = vshrl.u32 %v813_v56, 16  ;;  %v820_v62 = vpack.i.b16 %v813_v56, %v811_v42 }
 0x2c4   : > { %v2380_v57 = vpop.eup %1906  ;;  %v823_v0 = vpack.i.b16 %v822_v59, %v821_v61  ;;  %v834_v3 = vperm.slane %v820_v62, %v2271_v19 }
 0x2c5   : > { %v2382_v58 = vpop.eup %1908  ;;  %v1043_v60 = vsel %vm932_vm2, %v2380_v57, 0.0 }
 0x2c6   : > { %1044 = vadd.xlane.f32.xlu2 %v1043_v60  ;;  %v1046_v63 = vsel %vm932_vm2, %v2382_v58, 0.0  ;;  %v860_v6 = vperm.slane %v823_v0, %v2271_v19  ;;  %v842_v12 = vrot.slane %v834_v3, 4 }
 0x2c8   : > { %v868_v15 = vrot.slane %v860_v6, 4 }
 0x2c9   : > { %1047 = vadd.xlane.f32.xlu0 %v1046_v63 }
 0x2cc   : > { %v817_v4 = vpop.permute.xlu1 %816 }
 0x2cd   : > { %v826_v7 = vpack.i.b16 %v817_v4, %v815_v1  ;;  %v828_v8 = vshrl.u32 %v817_v4, 16 }
 0x2cf   : > { %v829_v13 = vpack.i.b16 %v828_v8, %v827_v5  ;;  %v839_v14 = vperm.slane %v826_v7, %v2271_v19 }
 0x2d1   : > { %v840_v16 = vrot.slane %v839_v14, 4  ;;  %v843_v17 = vsel %vm596_vm1, %v839_v14, %v842_v12  ;;  %v865_v18 = vperm.slane %v829_v13, %v2271_v19 }
 0x2d2   : > { %v851_v20 = vperm.slane %v843_v17, %v2280_v31 }
 0x2d3   : > { %v841_v21 = vsel %vm596_vm1, %v840_v16, %v834_v3  ;;  %v866_v22 = vrot.slane %v865_v18, 4  ;;  %v869_v23 = vsel %vm596_vm1, %v865_v18, %v868_v15 }
 0x2d4   : > { %v847_v24 = vperm.slane %v841_v21, %v2280_v31  ;;  %v854_v25 = vrot.slane %v851_v20, 4  ;;  %v877_v26 = vperm.slane %v869_v23, %v2280_v31 }
 0x2d5   : > { %v867_v27 = vsel %vm596_vm1, %v866_v22, %v860_v6 }
 0x2d6   : > { %v852_v28 = vrot.slane %v847_v24, 4  ;;  %v855_v29 = vsel %vm596_vm1, 0, %v854_v25  ;;  %v873_v30 = vperm.slane %v867_v27, %v2280_v31  ;;  %v880_v32 = vrot.slane %v877_v26, 4 }
 0x2d7   : > { %v887_v33 = vrot.slane %v855_v29, 4  ;;  %v882_v38 = vsel %vm596_vm1, %v854_v25, %v847_v24 }
 0x2d8   : > { %v853_v34 = vsel %vm596_vm1, 0, %v852_v28  ;;  %v878_v35 = vrot.slane %v873_v30, 4  ;;  %v881_v36 = vsel %vm596_vm1, 0, %v880_v32  ;;  %v901_v42 = vsel %vm596_vm1, %v880_v32, %v873_v30 }
 0x2d9   : > { %v906_v37 = vrot.slane %v881_v36, 4  ;;  %v888_v39 = vsel %vm596_vm1, %v887_v33, %v853_v34  ;;  %v886_v46 = vperm.slane %v882_v38, %v2271_v19  ;;  %v905_v52 = vperm.slane %v901_v42, %v2271_v19 }
 0x2da   : > { %v879_v40 = vsel %vm596_vm1, 0, %v878_v35  ;;  %v892_v41 = vperm.slane %v888_v39, %v2271_v19 }
 0x2db   : > { %v907_v43 = vsel %vm596_vm1, %v906_v37, %v879_v40 }
 0x2dc   : > { %v893_v49 = vrot.slane %v892_v41, 4  ;;  %v911_v50 = vperm.slane %v907_v43, %v2271_v19 }
 0x2de   : > { %v894_v51 = vsel %vm596_vm1, %v893_v49, %v886_v46  ;;  %v912_v45 = vrot.slane %v911_v50, 4 }
 0x2df   : > { %v898_v53 = vperm.slane %v894_v51, %v2280_v31 }
 0x2e0   : > { %v913_v11 = vsel %vm596_vm1, %v912_v45, %v905_v52 }
 0x2e1   : > { %v917_v9 = vperm.slane %v913_v11, %v2280_v31  ;;  %v899_v47 = vrot.slane %v898_v53, 4  ;;  %v923_v10 = vshrl.u32 %v898_v53, 16 }
 0x2e3   : > { %v922_v48 = vpack.i.b16 %v917_v9, %v898_v53  ;;  %v924_v55 = vshrl.u32 %v917_v9, 16  ;;  %v900_v56 = vsel %vm596_vm1, 0, %v899_v47  ;;  %v918_v59 = vrot.slane %v917_v9, 4 }
 0x2e4   : > { %v929_v0 = vshrl.u32 %v900_v56, 16 }
 0x2e5   : > { %v1122_v60 = vsel %vm1120_vm3, %v922_v48, 0  ;;  %v925_v61 = vpack.i.b16 %v924_v55, %v923_v10  ;;  %v919_v62 = vsel %vm596_vm1, 0, %v918_v59 }
 0x2e6   : > { %1131 = vmatpush.bf16.msrb.mxu1 %v1122_v60  ;;  %v928_v63 = vpack.i.b16 %v919_v62, %v900_v56  ;;  %v930_v1 = vshrl.u32 %v919_v62, 16 }
 0x2e7   : > { %v1141_v3 = vsel %vm1120_vm3, %v925_v61, 0 }
 0x2e8   : > { %1150 = vmatpush.bf16.msrb.mxu2 %v1141_v3  ;;  %v1160_v4 = vsel %vm1120_vm3, %v928_v63, 0  ;;  %v931_v5 = vpack.i.b16 %v930_v1, %v929_v0 }
 0x2e9   : > { %1169 = vmatpush.bf16.msrb.mxu3 %v1160_v4 }
 0x2ea   : > { %v1179_v6 = vsel %vm1120_vm3, %v931_v5, 0 }
 0x2eb   : > { %1188 = vmatpush.bf16.msra.mxu0 %v1179_v6 }
 0x32c   : > { %v1039_v7 = vpop.xlane.xlu1 %1038 }
 0x32d   : > { %1910 = vrcp.f32 %v1039_v7  ;;  %v1060_v16 = vand.u32 2147483648, %v1039_v7  ;;  %v1058_v17 = vand.u32 2147483647, %v1039_v7  ;;  %vm1054_vm5 = vweird.f32 %v1039_v7 }
 0x32f   : > { %v1061_v23 = vor.u32 1.1754944e-38, %v1060_v16  ;;  %vm1059_vm7 = vcmp.eq.f32.partialorder %v1058_v17, 8.507059e+37 }
 0x333   : > { %v1911_v8 = vpop.eup %1910 }
 0x334   : > { %v1050_v12 = vmul.f32 %v1911_v8, %v1039_v7  ;;  %v1042_v13 = vpop.xlane.xlu0 %1041  ;;  %vm1055_vm4 = vweird.f32 %v1911_v8 }
 0x335   : > { %1912 = vrcp.f32 %v1042_v13  ;;  %vm1056_vm6 = vmor %vm1054_vm5, %vm1055_vm4  ;;  %v1075_v28 = vand.u32 2147483648, %v1042_v13  ;;  %v1073_v33 = vand.u32 2147483647, %v1042_v13  ;;  %vm1069_vm9 = vweird.f32 %v1042_v13 }
 0x336   : > { %v1051_v14 = vsub.f32 1.0, %v1050_v12 }
 0x337   : > { %v1076_v38 = vor.u32 1.1754944e-38, %v1075_v28  ;;  %vm1074_vm11 = vcmp.eq.f32.partialorder %v1073_v33, 8.507059e+37 }
 0x338   : > { %v1052_v15 = vmul.f32 %v1911_v8, %v1051_v14 }
 0x339   : > { %v1045_v18 = vpop.xlane.xlu2 %1044 }
 0x33a   : > { %v1053_v20 = vadd.f32 %v1911_v8, %v1052_v15  ;;  %1914 = vrcp.f32 %v1045_v18  ;;  %v1090_v40 = vand.u32 2147483648, %v1045_v18  ;;  %v1088_v43 = vand.u32 2147483647, %v1045_v18 }
 0x33b   : > { %v1913_v21 = vpop.eup %1912  ;;  %vm1084_vm13 = vweird.f32 %v1045_v18 }
 0x33c   : > { %v1057_v22 = vsel %vm1056_vm6, %v1911_v8, %v1053_v20  ;;  %v1065_v24 = vmul.f32 %v1913_v21, %v1042_v13  ;;  %v1048_v25 = vpop.xlane.xlu0 %1047  ;;  %vm1070_vm8 = vweird.f32 %v1913_v21  ;;  %v1091_v52 = vor.u32 1.1754944e-38, %v1090_v40 }
 0x33d   : > { %1916 = vrcp.f32 %v1048_v25  ;;  %v1062_v27 = vsel %vm1059_vm7, %v1061_v23, %v1057_v22  ;;  %vm1071_vm10 = vmor %vm1069_vm9, %vm1070_vm8  ;;  %v1105_v45 = vand.u32 2147483648, %v1048_v25  ;;  %v1103_v11 = vand.u32 2147483647, %v1048_v25 }
 0x33e   : > { %v1066_v26 = vsub.f32 1.0, %v1065_v24  ;;  %v1063_v29 = vmul.f32 %v2372_v44, %v1062_v27  ;;  %vm1089_vm3 = vcmp.eq.f32.partialorder %v1088_v43, 8.507059e+37  ;;  %vm1099_vm4 = vweird.f32 %v1048_v25 }
 0x33f   : > { %v1106_v48 = vor.u32 1.1754944e-38, %v1105_v45  ;;  %vm1104_vm6 = vcmp.eq.f32.partialorder %v1103_v11, 8.507059e+37  ;;  %vm1330_vm7 = vcmask 195584  }
 0x340   : > { %v1915_v30 = vpop.eup %1914  ;;  %v1067_v32 = vmul.f32 %v1913_v21, %v1066_v26  ;;  %1109 = vst.msk [vmem:[%s2425_s27] sm:$0xff] %vm932_vm2, %v1063_v29  ;;  %v1113_v35 = vpack.c.bf16 %v1063_v29, %v1063_v29 }
 0x341   : > { %v1080_v34 = vmul.f32 %v1915_v30, %v1045_v18  ;;  %vm1085_vm12 = vweird.f32 %v1915_v30 }
 0x342   : > { %v1068_v36 = vadd.f32 %v1913_v21, %v1067_v32  ;;  %1759 = vmatmul.msk.bf16.vlgmr.msrb.gmra.mxu1 %vm932_vm2, %v1113_v35  ;;  %vm1086_vm14 = vmor %vm1084_vm13, %vm1085_vm12 }
 0x343   : > { %v1917_v37 = vpop.eup %1916  ;;  %v1081_v39 = vsub.f32 1.0, %v1080_v34 }
 0x344   : > { %v1072_v44 = vsel %vm1071_vm10, %v1913_v21, %v1068_v36  ;;  %v1095_v41 = vmul.f32 %v1917_v37, %v1048_v25  ;;  %vm1100_vm15 = vweird.f32 %v1917_v37 }
 0x345   : > { %v1082_v42 = vmul.f32 %v1915_v30, %v1081_v39  ;;  %v1077_v46 = vsel %vm1074_vm11, %v1076_v38, %v1072_v44  ;;  %vm1101_vm5 = vmor %vm1099_vm4, %vm1100_vm15  ;;  %vm1491_vm11 = vcmask 523264  }
 0x346   : > { %v1096_v49 = vsub.f32 1.0, %v1095_v41  ;;  %v1078_v50 = vmul.f32 %v2376_v54, %v1077_v46 }
 0x347   : > { %v1083_v51 = vadd.f32 %v1915_v30, %v1082_v42 }
 0x348   : > { %v1097_v53 = vmul.f32 %v1917_v37, %v1096_v49  ;;  %1110 = vst.msk [vmem:[%s2425_s27 + $0x8] sm:$0xff] %vm932_vm2, %v1078_v50  ;;  %v1114_v9 = vpack.c.bf16 %v1078_v50, %v1078_v50 }
 0x349   : > { %v1087_v47 = vsel %vm1086_vm14, %v1915_v30, %v1083_v51 }
 0x34a   : > { %v1098_v10 = vadd.f32 %v1917_v37, %v1097_v53  ;;  %1760 = vmatmul.msk.bf16.vlgmr.msrb.gmra.mxu2 %vm932_vm2, %v1114_v9  ;;  %v1092_v54 = vsel %vm1089_vm3, %v1091_v52, %v1087_v47 }
 0x34b   : > { %v1093_v55 = vmul.f32 %v2380_v57, %v1092_v54 }
 0x34c   : > { %v1102_v56 = vsel %vm1101_vm5, %v1917_v37, %v1098_v10 }
 0x34d   : > { %v1107_v59 = vsel %vm1104_vm6, %v1106_v48, %v1102_v56  ;;  %1111 = vst.msk [vmem:[%s2425_s27 + $0x10] sm:$0xff] %vm932_vm2, %v1093_v55  ;;  %v1115_v60 = vpack.c.bf16 %v1093_v55, %v1093_v55 }
 0x34e   : > { %v1108_v61 = vmul.f32 %v2382_v58, %v1107_v59 }
 0x34f   : > { %1761 = vmatmul.msk.bf16.vlgmr.msrb.gmra.mxu3 %vm932_vm2, %v1115_v60 }
 0x350   : > { %1112 = vst.msk [vmem:[%s2425_s27 + $0x18] sm:$0xff] %vm932_vm2, %v1108_v61  ;;  %v1116_v62 = vpack.c.bf16 %v1108_v61, %v1108_v61 }
 0x352   : > { %1762 = vmatmul.msk.bf16.vlgmr.msra.gmra.mxu0 %vm932_vm2, %v1116_v62 }
 0x3bf   : > { %v1133_v63 = vpop.f32.mrf.mxu1 }
 0x3c0   : > { %v1194_v1 = vpack.c.bf16 %v1133_v63, %v1133_v63 }
 0x3c2   : > { %v1201_v5 = vshrl.u32 %v1194_v1, 16 }
 0x3c7   : > { %v1135_v0 = vpop.f32.mrf.mxu1 }
 0x3cd   : > { %v1152_v3 = vpop.f32.mrf.mxu2 }
 0x3ce   : > { %v1195_v57 = vpack.c.bf16 %v1152_v3, %v1152_v3 }
 0x3cf   : > { %v1190_v4 = vpop.f32.mrf.mxu0 }
 0x3d0   : > { %v1200_v6 = vpack.i.b16 %v1195_v57, %v1194_v1  ;;  %v1202_v7 = vshrl.u32 %v1195_v57, 16  ;;  %v1197_v8 = vpack.c.bf16 %v1190_v4, %v1190_v4 }
 0x3d2   : > { %v1203_v12 = vpack.i.b16 %v1202_v7, %v1201_v5  ;;  %v1171_v13 = vpop.f32.mrf.mxu3  ;;  %v1214_v58 = vperm.slane %v1200_v6, %v2271_v19  ;;  %v1208_v16 = vshrl.u32 %v1197_v8, 16 }
 0x3d3   : > { %v1196_v14 = vpack.c.bf16 %v1171_v13, %v1171_v13 }
 0x3d4   : > { %v1240_v15 = vperm.slane %v1203_v12, %v2271_v19  ;;  %v1222_v21 = vrot.slane %v1214_v58, 4 }
 0x3d5   : > { %v1206_v17 = vpack.i.b16 %v1197_v8, %v1196_v14  ;;  %v1207_v18 = vshrl.u32 %v1196_v14, 16  ;;  %v1154_v20 = vpop.f32.mrf.mxu2 }
 0x3d6   : > { %v1248_v25 = vrot.slane %v1240_v15, 4 }
 0x3d7   : > { %v1209_v22 = vpack.i.b16 %v1208_v16, %v1207_v18  ;;  %v1219_v23 = vperm.slane %v1206_v17, %v2271_v19  ;;  %v1192_v24 = vpop.f32.mrf.mxu0  ;;  %v1811_v16 = vld [vmem:[%s2643_s3 + $0x8] sm:$0xff]  ;;  %v1810_v17 = vld [vmem:[%s2643_s3] sm:$0xff]  ;;  %s1970_s3 = sshra.s32 %s1582_s20, 4  ;;  %s1971_s3 = int_to_ptr.hbm [resolvable:$true] %s1970_s3 }
 0x3d8   : > { %1361 = vmatpush.bf16.msra.mxu1 %v1811_v16  ;;  %p1977_p3 = scmp.lt.s32.totalorder %s1971_s3, %s2617_s14 }
 0x3d9   : > { %v1220_v26 = vrot.slane %v1219_v23, 4  ;;  %v1223_v27 = vsel %vm596_vm1, %v1219_v23, %v1222_v21  ;;  %v1245_v28 = vperm.slane %v1209_v22, %v2271_v19 }
 0x3da   : > { %v1231_v29 = vperm.slane %v1223_v27, %v2280_v31  ;;  %v1173_v30 = vpop.f32.mrf.mxu3 }
 0x3db   : > { %v1221_v32 = vsel %vm596_vm1, %v1220_v26, %v1214_v58  ;;  %v1246_v33 = vrot.slane %v1245_v28, 4  ;;  %v1249_v34 = vsel %vm596_vm1, %v1245_v28, %v1248_v25  ;;  %v1895_v25 = vld [vmem:[%s2644_s4] ss:$0 sm:$0xff]  ;;  %s1972_s4 = scalar_lea.hbm %s1971_s3, 32 }
 0x3dc   : > { %v1227_v35 = vperm.slane %v1221_v32, %v2280_v31  ;;  %v1234_v36 = vrot.slane %v1231_v29, 4  ;;  %v1257_v37 = vperm.slane %v1249_v34, %v2280_v31  ;;  %1362 = vmatpush.bf16.msra.mxu1 %v1810_v17  ;;  %v2097_v32 = vmov 32.0   ;;  %p1973_p0 = scmp.ne.s32.totalorder %s1971_s3, %s1972_s4 }
 0x3dd   : > { %v1247_v38 = vsel %vm596_vm1, %v1246_v33, %v1240_v15  ;;  %1918 = vrcp.f32 %v2097_v32 }
 0x3de   : > { %v1232_v39 = vrot.slane %v1227_v35, 4  ;;  %v1235_v40 = vsel %vm596_vm1, 0, %v1234_v36  ;;  %v1253_v44 = vperm.slane %v1247_v38, %v2280_v31  ;;  %v1260_v41 = vrot.slane %v1257_v37, 4  ;;  %p1974_p1 = pnand %p1973_p0, %p2219_p5 }
 0x3df   : > { %v1267_v42 = vrot.slane %v1235_v40, 4  ;;  %v1262_v50 = vsel %vm596_vm1, %v1234_v36, %v1227_v35 }
 0x3e0   : > { %v1233_v43 = vsel %vm596_vm1, 0, %v1232_v39  ;;  %v1258_v46 = vrot.slane %v1253_v44, 4  ;;  %v1261_v49 = vsel %vm596_vm1, 0, %v1260_v41  ;;  %v1281_v11 = vsel %vm596_vm1, %v1260_v41, %v1253_v44  ;;  %p1975_p2 = pneg %p1974_p1 }
 0x3e1   : > { %v1268_v51 = vsel %vm596_vm1, %v1267_v42, %v1233_v43  ;;  %v1286_v52 = vrot.slane %v1261_v49, 4  ;;  %v1266_v47 = vperm.slane %v1262_v50, %v2271_v19  ;;  %v1285_v55 = vperm.slane %v1281_v11, %v2271_v19  ;;  %v1813_v42 = vld [vmem:[#allocation2 + $0x8] sm:$0xff]  ;;  %v1812_v43 = vld [vmem:[#allocation2] sm:$0xff] }
 0x3e2   : > { %v1259_v45 = vsel %vm596_vm1, 0, %v1258_v46  ;;  %v1272_v53 = vperm.slane %v1268_v51, %v2271_v19  ;;  %1438 = vmatpush.bf16.msra.mxu2 %v1813_v42 }
 0x3e3   : > { %v1287_v9 = vsel %vm596_vm1, %v1286_v52, %v1259_v45  ;;  %v1919_v33 = vpop.eup %1918 }
 0x3e4   : > { %v1273_v10 = vrot.slane %v1272_v53, 4  ;;  %v1291_v54 = vperm.slane %v1287_v9, %v2271_v19  ;;  %v1375_v34 = vmul.f32 32.0, %v1919_v33 }
 0x3e6   : > { %v1274_v48 = vsel %vm596_vm1, %v1273_v10, %v1266_v47  ;;  %v1292_v56 = vrot.slane %v1291_v54, 4  ;;  %v1376_v35 = vsub.f32 1.0, %v1375_v34  ;;  %1439 = vmatpush.bf16.msra.mxu2 %v1812_v43  ;;  %v1896_v47 = vld [vmem:[%s2645_s5] ss:$0 sm:$0xff] }
 0x3e7   : > { %v1278_v59 = vperm.slane %v1274_v48, %v2280_v31  ;;  %v1897_v54 = vld [vmem:[%s2609_s6] ss:$0 sm:$0xff] }
 0x3e8   : > { %v1293_v60 = vsel %vm596_vm1, %v1292_v56, %v1285_v55  ;;  %v1377_v36 = vmul.f32 %v1919_v33, %v1376_v35 }
 0x3e9   : > { %v1297_v61 = vperm.slane %v1293_v60, %v2280_v31  ;;  %v1279_v62 = vrot.slane %v1278_v59, 4  ;;  %v1303_v63 = vshrl.u32 %v1278_v59, 16  ;;  %v1817_v60 = vld [vmem:[%s2612_s9 + $0x18] sm:$0xff] }
 0x3ea   : > { %v1378_v37 = vadd.f32 %v1919_v33, %v1377_v36  ;;  %1499 = vmatpush.bf16.msra.mxu3 %v1817_v60 }
 0x3eb   : > { %v1304_v0 = vshrl.u32 %v1297_v61, 16  ;;  %v1280_v1 = vsel %vm596_vm1, 0, %v1279_v62  ;;  %v1298_v3 = vrot.slane %v1297_v61, 4  ;;  %v1302_v57 = vpack.i.b16 %v1297_v61, %v1278_v59  ;;  %v1816_v61 = vld [vmem:[%s2612_s9 + $0x10] sm:$0xff]  ;;  %v1815_v62 = vld [vmem:[%s2612_s9 + $0x8] sm:$0xff] }
 0x3ec   : > { %v1309_v7 = vshrl.u32 %v1280_v1, 16 }
 0x3ed   : > { %v1305_v4 = vpack.i.b16 %v1304_v0, %v1303_v63  ;;  %v1299_v5 = vsel %vm596_vm1, 0, %v1298_v3  ;;  %vm1327_vm1 = vcmask 130048   ;;  %v1814_v63 = vld [vmem:[%s2612_s9] sm:$0xff] }
 0x3ee   : > { %v1308_v6 = vpack.i.b16 %v1299_v5, %v1280_v1  ;;  %v1310_v19 = vshrl.u32 %v1299_v5, 16  ;;  %1500 = vmatpush.bf16.msra.mxu3 %v1816_v61  ;;  %v1898_v0 = vld [vmem:[%s2611_s8] ss:$0 sm:$0xff] }
 0x3ef   : > { %v1312_v8 = vunpack.c.l.b16 %v1305_v4 }
 0x3f0   : > { %v1316_v12 = vunpack.c.l.b16 %v1308_v6  ;;  %v1311_v13 = vpack.i.b16 %v1310_v19, %v1309_v7 }
 0x3f1   : > { %v1313_v58 = vpack.c.b16 %v1312_v8, %v1312_v8 }
 0x3f2   : > { %v1317_v14 = vpack.c.b16 %v1316_v12, %v1316_v12  ;;  %v1320_v15 = vunpack.c.l.b16 %v1311_v13  ;;  %1501 = vmatpush.bf16.msra.mxu3 %v1815_v62 }
 0x3f3   : > { %1314 = vrot.lane.b32.xlu2 %v1313_v58, %s2624_s7 }
 0x3f4   : > { %1318 = vrot.lane.b32.xlu1 %v1317_v14, %s2095_s17  ;;  %v1321_v31 = vpack.c.b16 %v1320_v15, %v1320_v15  ;;  %v1899_v15 = vld [vmem:[%s2613_s10] ss:$0 sm:$0xff]  ;;  %s1976_s17 = scalar_lea.hbm %s2617_s14, 64 }
 0x3f5   : > { %p1978_p4 = scmp.lt.s32.totalorder %s1976_s17, %s1972_s4 }
 0x3f6   : > { %1322 = vrot.lane.b32.xlu0 %v1321_v31, %s2096_s24  ;;  %1502 = vmatpush.bf16.msra.mxu3 %v1814_v63 }
 0x3f7   : > { %p1979_p7 = por %p1978_p4, %p1977_p3 }
 0x3f9   : > { %p1980_p8 = pnand %p1979_p7, %p1975_p2 }
 0x44d   : > { %v1315_v18 = vpop.permute.xlu2 %1314 }
 0x44e   : > { %v1326_v20 = vsel %vm932_vm2, %v1302_v57, %v1315_v18  ;;  %vm1379_vm2 = vweird.f32 %v1919_v33 }
 0x44f   : > { %v2486_v38 = vsel %vm1379_vm2, %v1919_v33, %v1378_v37 }
 0x466   : > { %v1319_v21 = vpop.permute.xlu1 %1318 }
 0x467   : > { %v1329_v22 = vsel %vm1327_vm1, %v1326_v20, %v1319_v21 }
 0x468   : > { %v1323_v23 = vpop.permute.xlu0 %1322 }
 0x469   : > { %v1332_v24 = vsel %vm1330_vm7, %v1329_v22, %v1323_v23 }
 0x46a   : > { %1771 = vmatmul.msk.bf16.vlgmr.msra.gmra.mxu1 %vm548_vm0, %v1332_v24 }
 0x4e7   : > { %v1364_v26 = vpop.f32.mrf.mxu1 }
 0x4e8   : > { %v1365_v27 = vadd.f32 %v1895_v25, %v1364_v26 }
 0x4ea   : > { %v1368_v28 = vadd.f32 %v1365_v27, %v2250_v2 }
 0x4ec   : > { %v1371_v29 = vsel %vm548_vm0, %v1368_v28, 0.0 }
 0x4ed   : > { %1372 = vadd.xlane.f32.xlu2 %v1371_v29 }
 0x4ef   : > { %v1366_v30 = vpop.f32.mrf.mxu1 }
 0x560   : > { %v1373_v39 = vpop.xlane.xlu2 %1372 }
 0x561   : > { %v1381_v40 = vmul.f32 %v2486_v38, %v1373_v39 }
 0x563   : > { %v1382_v44 = vsub.f32 %v1368_v28, %v1381_v40 }
 0x565   : > { %v1383_v41 = vmul.f32 %v1382_v44, %v1382_v44 }
 0x567   : > { %v1384_v2 = vsel %vm548_vm0, %v1383_v41, 0.0 }
 0x568   : > { %1385 = vadd.xlane.f32.xlu0 %v1384_v2 }
 0x5db   : > { %v1386_v46 = vpop.xlane.xlu0 %1385 }
 0x5dc   : > { %v1387_v49 = vmul.f32 %v1386_v46, %v2486_v38 }
 0x5de   : > { %v1388_v50 = vadd.f32 1e-05, %v1387_v49 }
 0x5e0   : > { %1920 = vrsqrt.f32 %v1388_v50  ;;  %vm1395_vm9 = vweird.f32 %v1388_v50 }
 0x5e6   : > { %v1921_v51 = vpop.eup %1920 }
 0x5e7   : > { %v1390_v52 = vmul.f32 %v1921_v51, %v1388_v50  ;;  %vm1396_vm8 = vweird.f32 %v1921_v51 }
 0x5e8   : > { %vm1397_vm10 = vmor %vm1395_vm9, %vm1396_vm8 }
 0x5e9   : > { %v1391_v45 = vmul.f32 %v1921_v51, %v1390_v52 }
 0x5eb   : > { %v1392_v53 = vmul.f32 0.5, %v1391_v45 }
 0x5ed   : > { %v1393_v11 = vsub.f32 1.5, %v1392_v53 }
 0x5ef   : > { %v1394_v9 = vmul.f32 %v1921_v51, %v1393_v11 }
 0x5f1   : > { %v1398_v10 = vsel %vm1397_vm10, %v1921_v51, %v1394_v9 }
 0x5f2   : > { %v1399_v48 = vmul.f32 %v1398_v10, %v1382_v44 }
 0x5f4   : > { %v1403_v55 = vmul.f32 %v1896_v47, %v1399_v48 }
 0x5f6   : > { %v1407_v56 = vadd.f32 %v1897_v54, %v1403_v55 }
 0x5f8   : > { %v1408_v59 = vpack.c.bf16 %v1407_v56, %v1407_v56 }
 0x5fa   : > { %1780 = vmatmul.msk.bf16.vlgmr.msra.gmra.mxu2 %vm548_vm0, %v1408_v59 }
 0x67d   : > { %v1441_v1 = vpop.f32.mrf.mxu2 }
 0x67e   : > { %v1442_v3 = vadd.f32 %v1898_v0, %v1441_v1 }
 0x680   : > { %v1445_v57 = vmul.f32 %v1442_v3, %v1442_v3 }
 0x682   : > { %v1446_v4 = vmul.f32 %v1445_v57, %v1442_v3 }
 0x684   : > { %v1447_v5 = vmul.f32 0.044715, %v1446_v4 }
 0x685   : > { %v1443_v6 = vpop.f32.mrf.mxu2 }
 0x686   : > { %v1448_v7 = vadd.f32 %v1447_v5, %v1442_v3 }
 0x688   : > { %v1449_v19 = vmul.f32 0.7978846, %v1448_v7 }
 0x68a   : > { %1922 = vtanh.f32 %v1449_v19 }
 0x690   : > { %v1923_v8 = vpop.eup %1922 }
 0x691   : > { %v1451_v12 = vadd.f32 1.0, %v1923_v8 }
 0x693   : > { %v1452_v13 = vmul.f32 0.5, %v1451_v12 }
 0x695   : > { %v1453_v58 = vmul.f32 %v1452_v13, %v1442_v3 }
 0x697   : > { %v1454_v14 = vpack.c.bf16 %v1453_v58, %v1453_v58 }
 0x699   : > { %1797 = vmatmul.msk.bf16.vlgmr.msra.gmra.mxu3 %vm1491_vm11, %v1454_v14 }
 0x71c   : > { %v1504_v31 = vpop.f32.mrf.mxu3 }
 0x71d   : > { %v1505_v16 = vadd.f32 %v1899_v15, %v1504_v31 }
 0x71f   : > { %v1508_v17 = vadd.f32 %v1505_v16, %v1407_v56 }
 0x721   : > { %v1511_v18 = vsel %vm548_vm0, %v1508_v17, 0.0 }
 0x722   : > { %1512 = vadd.xlane.f32.xlu1 %v1511_v18 }
 0x724   : > { %v1506_v20 = vpop.f32.mrf.mxu3 }
 0x795   : > { %v1513_v21 = vpop.xlane.xlu1 %1512 }
 0x796   : > { %v1514_v22 = vmul.f32 %v1513_v21, %v2486_v38 }
 0x798   : > { %v2518_v23 = vsub.f32 %v1508_v17, %v1514_v22 }
 0x79a   : > { %v1516_v24 = vmul.f32 %v2518_v23, %v2518_v23 }
 0x79c   : > { %v1517_v25 = vsel %vm548_vm0, %v1516_v24, 0.0 }
 0x79d   : > { %1518 = vadd.xlane.f32.xlu2 %v1517_v25 }
 0x79e   : > { %1983 = shalt.err (!%p1980_p8)
}
 0x79f   : > { %s2098_s30 = smov 128   ;;  %s2646_s25 = smov 8  }
 0x7a0   : > { %1825 = dma.vmem_to_hbm [thread:$0]  (%p2219_p5), %s1580_s1, 512, %s1582_s20, %s2532_s2, %s2098_s30, %s2098_s30, %s2646_s25  }
 0x7a1   : > { %s1596_s26 = sshll.u32 %s2352_s23, 4  ;;  %s1598_s7 = sshll.u32 %s1595_s0, 4  ;;  %s1597_s26 = int_to_ptr.vmem [resolvable:$true] %s1596_s26  ;;  %s1599_s7 = int_to_ptr.hbm [resolvable:$true] %s1598_s7 }
 0x7a2   : > { %s1998_s5 = sshra.s32 %s1599_s7, 4  ;;  %s2004_s17 = scalar_lea.hbm %s2618_s15, 64  ;;  %s1999_s5 = int_to_ptr.hbm [resolvable:$true] %s1998_s5 }
 0x7a3   : > { %s2000_s27 = scalar_lea.hbm %s1999_s5, 32  ;;  %p2005_p12 = scmp.lt.s32.totalorder %s1999_s5, %s2618_s15 }
 0x7a4   : > { %p2001_p9 = scmp.ne.s32.totalorder %s1999_s5, %s2000_s27  ;;  %p2006_p13 = scmp.lt.s32.totalorder %s2004_s17, %s2000_s27 }
 0x7a6   : > { %p2002_p10 = pnand %p2001_p9, %p2219_p5  ;;  %p2007_p0 = por %p2006_p13, %p2005_p12 }
 0x7a8   : > { %p2003_p11 = pneg %p2002_p10 }
 0x7aa   : > { %p2008_p1 = pnand %p2007_p0, %p2003_p11 }
 0x7ac   : > { %2011 = shalt.err (!%p2008_p1)
}
 0x7ad   : > { %1826 = dma.vmem_to_hbm [thread:$0]  (%p2219_p5), %s1597_s26, 512, %s1599_s7, %s2532_s2, %s2098_s30, %s2098_s30, %s2646_s25  }
 0x7ae   : > { %s1742_s23 = sshll.u32 %s2347_s16, 3  ;;  %s1801_s1 = sshll.u32 %s2200_s22, 3  ;;  %v1900_v36 = vld [vmem:[%s2614_s11] ss:$0 sm:$0xff] }
 0x7af   : > { %s1563_s25 = scalar_lea.hbm %s2616_s13, %s1801_s1  ;;  %v1901_v39 = vld [vmem:[%s2615_s12] ss:$0 sm:$0xff]  ;;  %s506_s22 = scalar_lea.vmem [#allocation5], %s1742_s23 }
 0x7b0   : > { %s1565_s5 = sshll.u32 %s506_s22, 4  ;;  %s1567_s27 = sshll.u32 %s1563_s25, 4  ;;  %s1566_s5 = int_to_ptr.vmem [resolvable:$true] %s1565_s5  ;;  %s1568_s27 = int_to_ptr.hbm [resolvable:$true] %s1567_s27 }
 0x7b1   : > { %s1543_s3 = scalar_lea.sflag [#allocation4], %s2347_s16  ;;  %s2026_s4 = sshra.s32 %s1568_s27, 4  ;;  %s2027_s4 = int_to_ptr.hbm [resolvable:$true] %s2026_s4 }
 0x7b2   : > { %s2028_s17 = scalar_lea.hbm %s2027_s4, 8  ;;  %s2032_s23 = scalar_lea.hbm %s2616_s13, 16 }
 0x7b3   : > { %p2029_p2 = scmp.ne.s32.totalorder %s2027_s4, %s2028_s17  ;;  %p2033_p7 = scmp.lt.s32.totalorder %s2027_s4, %s2616_s13 }
 0x7b4   : > { %p2034_p8 = scmp.lt.s32.totalorder %s2032_s23, %s2028_s17 }
 0x7b5   : > { %p2030_p3 = pnand %p2029_p2, %p2219_p5 }
 0x7b6   : > { %p2035_p9 = por %p2034_p8, %p2033_p7 }
 0x7b7   : > { %p2031_p4 = pneg %p2030_p3 }
 0x7b9   : > { %p2036_p10 = pnand %p2035_p9, %p2031_p4 }
 0x810   : > { %v1519_v26 = vpop.xlane.xlu2 %1518 }
 0x811   : > { %v1520_v27 = vmul.f32 %v1519_v26, %v2486_v38 }
 0x813   : > { %v1521_v28 = vadd.f32 1e-05, %v1520_v27 }
 0x815   : > { %1924 = vrsqrt.f32 %v1521_v28  ;;  %vm1528_vm13 = vweird.f32 %v1521_v28 }
 0x81b   : > { %v1925_v29 = vpop.eup %1924 }
 0x81c   : > { %v1523_v30 = vmul.f32 %v1925_v29, %v1521_v28  ;;  %vm1529_vm12 = vweird.f32 %v1925_v29 }
 0x81d   : > { %vm1530_vm14 = vmor %vm1528_vm13, %vm1529_vm12 }
 0x81e   : > { %v1524_v32 = vmul.f32 %v1925_v29, %v1523_v30 }
 0x820   : > { %v1525_v33 = vmul.f32 0.5, %v1524_v32 }
 0x822   : > { %v1526_v34 = vsub.f32 1.5, %v1525_v33 }
 0x824   : > { %v1527_v35 = vmul.f32 %v1925_v29, %v1526_v34 }
 0x826   : > { %v1531_v37 = vsel %vm1530_vm14, %v1925_v29, %v1527_v35 }
 0x827   : > { %v1532_v38 = vmul.f32 %v1531_v37, %v2518_v23 }
 0x829   : > { %v1536_v40 = vmul.f32 %v1900_v36, %v1532_v38 }
 0x82b   : > { %v1540_v44 = vadd.f32 %v1901_v39, %v1536_v40 }
 0x82d   : > { %1541 = vst.msk [vmem:[%s506_s22] sm:$0xff] %vm548_vm0, %v1540_v44 }
 0x82e   : > { %2039 = shalt.err (!%p2036_p10)
}
 0x82f   : > { %1824 = dma.vmem_to_hbm [thread:$0]  (%p2219_p5), %s1566_s5, 128, %s1568_s27, %s1543_s3  }
 0x830 PF: > { %p1846_p11 = scmp.ge.s32.totalorder %s2082_s21, 2  ;;  %s1613_s0 = sand.u32 1, %s2070_s18  }
 0x831   : > { %s1614_s2 = scalar_lea.sflag [#allocation4], %s1613_s0 }
 0x832   : > { %p1835_p12 = pnand %p1846_p11, %p2223_p6 }
 0x834   : > { %p1836_p13 = pneg %p1835_p12 }
 0x836   : > { %2061 = dma.done.wait (%p1836_p13), %s1614_s2, 128  }
 0x837   : > { %2063 = vsyncadd (%p1836_p13), %s1614_s2, 4294967168  ;;  %s2648_s30 = sadd.s32 4294967294, %s2082_s21  }
 0x838   : > { %s1623_s25 = sand.u32 1, %s2648_s30  }
 0x839   : > { %s1624_s26 = scalar_lea.sflag [#allocation7], %s1623_s25 }
 0x83a   : > { %2065 = dma.done.wait (%p1836_p13), %s1624_s26, 1024  }
 0x83b   : > { %2067 = vsyncadd (%p1836_p13), %s1624_s26, 4294966272  ;;  %s2649_s21 = sld [smem:[#allocation13_spill]]  ;;  %s2652_s18 = smov %s2074_s19 }
 0x83c   : > { %s2650_s28 = sld [smem:[#allocation12_spill]] }
 0x83d   : > { %s2651_s20 = sld [smem:[#allocation14_spill]] }
 0x841   : > { %p30_p5 = scmp.ge.s32.totalorder %s2649_s21, 4  }
 0x842   : > { %s2653_s19 = smov %s2650_s28 }
 0x843   :  { %32 = sbr.rel (!%p30_p5) target bundleno = 14 (0xe), region = 144 }
 0x848   :  { %1640 = vsyncpa [#allocation3], 1 }
 0x849   :  { %1642 = vsyncpa [#allocation3 + $0x1], 1 }
 0x84a   :  { %1643 = vsyncpa [#allocation4], 1 }
 0x84b   :  { %1645 = vsyncpa [#allocation4 + $0x1], 1 }
 0x84c   :  { %1646 = vsyncpa [#allocation7], 1 }
 0x84d   :  { %1648 = vsyncpa [#allocation7 + $0x1], 1 }

</bundles_post_ra>
